<compile_context>
chip_gen: v7x
topology: tpu7x:2x2x1
jax: 0.10.0
libtpu: 0.0.40
codegen_flags: <defaults>
</compile_context>

<pallas_src>
import functools

import jax
import jax.numpy as jnp
from jax.experimental import pallas as pl
from jax.experimental.pallas import tpu as pltpu

RELU_SLOPE = 0.2   # HinResBlock LeakyReLU slope
EPS = 1e-5         # nn.InstanceNorm2d default eps
CLAMP = 0.8        # InvBlock default clamp


def _make_invblock_kernel(H, W, split1):
    """Builds the kernel closure for a given image size / channel split."""
    HW = H * W
    Cs = split1          # all three subnets map Cs -> Cs (split1 == split2)
    half = Cs // 2       # channels normalized by the half-instance-norm

    def kernel(x_ref, winv_ref, masks_ref,
               w1_ref, b1_ref, w2_ref, b2_ref, gam_ref, bet_ref,
               o_ref, col_ref):
        # x_ref   : (1, C, HW)        one batch element, channels-first, flat spatial
        # winv_ref: (C, C)            dense invertible-1x1 weight (P @ L @ U)
        # masks_ref: (9, HW)          per-tap zero-padding validity masks
        # w1/w2_ref: (3, Cs, 9*Cs)    stacked [F, G, H] conv weights (im2col layout)
        # b1/b2_ref: (3, Cs, 1)       stacked conv biases
        # gam/bet_ref: (3, half, 1)   stacked HIN affine params
        # o_ref   : (1, C, HW)
        # col_ref : (9*Cs, HW) VMEM   im2col scratch, reused by every conv

        def lrelu(v):
            return jnp.where(v > 0, v, RELU_SLOPE * v)

        def conv3x3(v, w, b):
            # v: (Cs, HW).  Build im2col once, then a single K=9*Cs MXU matmul.
            for k in range(9):
                dy, dx = divmod(k, 3)
                d = (dy - 1) * W + (dx - 1)          # flat source offset
                if d == 0:
                    col_ref[k * Cs:(k + 1) * Cs, :] = v          # center tap
                else:
                    shifted = pltpu.roll(v, (-d) % HW, 1)        # XLU lane rotate
                    col_ref[k * Cs:(k + 1) * Cs, :] = (
                        shifted * masks_ref[k:k + 1, :])
            return jnp.dot(w, col_ref[...],
                           preferred_element_type=jnp.float32) + b

        def hin_res_block(v, idx):
            # HinResBlock subnet; idx: 0 = F, 1 = G, 2 = H.
            w1 = w1_ref[idx]
            b1 = b1_ref[idx]
            w2 = w2_ref[idx]
            b2 = b2_ref[idx]
            gamma = gam_ref[idx]
            beta = bet_ref[idx]

            r = lrelu(conv3x3(v, w1, b1))                       # (Cs, HW)

            # half-instance-norm on the first `half` channel rows (sublane slice),
            # fused single-pass stats: var = E[h^2] - mean^2 (biased, as IN2d).
            h = r[:half, :]
            mean = jnp.mean(h, axis=1, keepdims=True)           # (half, 1)
            msq = jnp.mean(h * h, axis=1, keepdims=True)
            var = msq - mean * mean
            hn = (h - mean) * jax.lax.rsqrt(var + EPS) * gamma + beta
            r = jnp.concatenate([hn, r[half:, :]], axis=0)      # (Cs, HW)

            r = lrelu(conv3x3(r, w2, b2))
            return v + r

        x = x_ref[0].astype(jnp.float32)                        # (C, HW)

        # Invertible 1x1 conv == channel mixing matmul (logdet discarded upstream).
        z = jnp.dot(winv_ref[...], x, preferred_element_type=jnp.float32)

        x1 = z[:split1, :]
        x2 = z[split1:, :]

        y1 = x1 + hin_res_block(x2, 0)                          # F
        t = hin_res_block(y1, 2)                                # H
        sig = 1.0 / (1.0 + jnp.exp(-t))
        s = CLAMP * (sig * 2.0 - 1.0)
        y2 = x2 * jnp.exp(s) + hin_res_block(y1, 1)             # G

        o_ref[0] = jnp.concatenate([y1, y2], axis=0).astype(o_ref.dtype)

    return kernel


def _hwio_to_mat(w):
    # (3, 3, Cin, Cout) HWIO -> (Cout, 9*Cin), tap-major k = ky*3+kx, Cin fastest
    # (must match the im2col row ordering inside the kernel).
    kh, kw, cin, cout = w.shape
    return jnp.transpose(w, (3, 0, 1, 2)).reshape(cout, kh * kw * cin)


def _tap_masks(H, W):
    # masks[k, p] = 1 if the 3x3 tap k at output pixel p reads a real (non-pad)
    # input pixel; 0 where the PyTorch conv would read zero padding.
    p = jnp.arange(H * W)
    r, c = p // W, p % W
    masks = []
    for dy in range(3):
        for dx in range(3):
            sy, sx = dy - 1, dx - 1
            valid = ((r + sy >= 0) & (r + sy < H) &
                     (c + sx >= 0) & (c + sx < W))
            masks.append(valid.astype(jnp.float32))
    return jnp.stack(masks, axis=0)                              # (9, H*W)


def inv_block(x, w_inv, params_f, params_g, params_h, split1):
    """InvBlock forward.

    x        : (N, C, H, W) float32 (NCHW, as in PyTorch)
    w_inv    : (C, C) dense invertible-1x1 weight (already P @ L @ U)
    params_* : dict with w1, w2: (3,3,Cs,Cs) HWIO; b1, b2: (Cs,);
               gamma, beta: (Cs//2,)  -- HinResBlock parameters for F, G, H.
    """
    N, C, H, W = x.shape
    HW = H * W
    assert C - split1 == split1, "HinResBlock residual requires split1 == split2"
    Cs = split1
    half = Cs // 2

    subs = (params_f, params_g, params_h)            # kernel index: 0=F, 1=G, 2=H
    W1 = jnp.stack([_hwio_to_mat(p["w1"]) for p in subs])        # (3, Cs, 9*Cs)
    W2 = jnp.stack([_hwio_to_mat(p["w2"]) for p in subs])
    B1 = jnp.stack([p["b1"].reshape(Cs, 1) for p in subs])       # (3, Cs, 1)
    B2 = jnp.stack([p["b2"].reshape(Cs, 1) for p in subs])
    GA = jnp.stack([p["gamma"].reshape(half, 1) for p in subs])  # (3, half, 1)
    BE = jnp.stack([p["beta"].reshape(half, 1) for p in subs])
    masks = _tap_masks(H, W)

    x_flat = x.reshape(N, C, HW)                      # lane axis = HW (lane-dense)

    kernel = _make_invblock_kernel(H, W, split1)

    out_flat = pl.pallas_call(
        kernel,
        out_shape=jax.ShapeDtypeStruct((N, C, HW), x.dtype),
        grid_spec=pltpu.PrefetchScalarGridSpec(
            num_scalar_prefetch=0,
            grid=(N,),
            in_specs=[
                pl.BlockSpec((1, C, HW), lambda n: (n, 0, 0)),
                pl.BlockSpec((C, C), lambda n: (0, 0)),
                pl.BlockSpec((9, HW), lambda n: (0, 0)),
                pl.BlockSpec((3, Cs, 9 * Cs), lambda n: (0, 0, 0)),
                pl.BlockSpec((3, Cs, 1), lambda n: (0, 0, 0)),
                pl.BlockSpec((3, Cs, 9 * Cs), lambda n: (0, 0, 0)),
                pl.BlockSpec((3, Cs, 1), lambda n: (0, 0, 0)),
                pl.BlockSpec((3, half, 1), lambda n: (0, 0, 0)),
                pl.BlockSpec((3, half, 1), lambda n: (0, 0, 0)),
            ],
            out_specs=pl.BlockSpec((1, C, HW), lambda n: (n, 0, 0)),
            scratch_shapes=[pltpu.VMEM((9 * Cs, HW), jnp.float32)],
        ),
        compiler_params=pltpu.CompilerParams(
            dimension_semantics=("parallel",),
            vmem_limit_bytes=32 * 1024 * 1024),
    )(x_flat, w_inv, masks, W1, B1, W2, B2, GA, BE)

    return out_flat.reshape(N, C, H, W)


# ----------------------------- pure-JAX reference -----------------------------

def _lrelu_ref(v):
    return jnp.where(v > 0, v, RELU_SLOPE * v)


def _conv_ref(v, w, b):
    y = jax.lax.conv_general_dilated(
        v, w, window_strides=(1, 1), padding=((1, 1), (1, 1)),
        dimension_numbers=("NCHW", "HWIO", "NCHW"),
        precision=jax.lax.Precision.HIGHEST)
    return y + b[None, :, None, None]


def _hin_ref(v, p):
    r = _lrelu_ref(_conv_ref(v, p["w1"], p["b1"]))
    half = r.shape[1] // 2
    o1, o2 = r[:, :half], r[:, half:]
    mean = o1.mean(axis=(2, 3), keepdims=True)
    var = o1.var(axis=(2, 3), keepdims=True)          # biased, as InstanceNorm2d
    o1 = ((o1 - mean) / jnp.sqrt(var + EPS) * p["gamma"][None, :, None, None]
          + p["beta"][None, :, None, None])
    r = _lrelu_ref(_conv_ref(jnp.concatenate([o1, o2], axis=1), p["w2"], p["b2"]))
    return v + r


def inv_block_ref(x, w_inv, pf, pg, ph, split1):
    z = jnp.einsum("oi,nihw->nohw", w_inv, x)
    x1, x2 = z[:, :split1], z[:, split1:]
    y1 = x1 + _hin_ref(x2, pf)
    s = CLAMP * (jax.nn.sigmoid(_hin_ref(y1, ph)) * 2.0 - 1.0)
    y2 = x2 * jnp.exp(s) + _hin_ref(y1, pg)
    return jnp.concatenate([y1, y2], axis=1)


# ------------------------------------ main ------------------------------------

if __name__ == "__main__":
    N, C, H, W = 2, 8, 16, 16
    split1 = C // 2            # channel_split_num = channel_num // 2
    Cs, half = split1, split1 // 2

    key = jax.random.PRNGKey(0)
    keys = jax.random.split(key, 32)
    ki = iter(keys)

    # InvertibleConv1x1 (LU_decomposed=True) parameters -> dense 1x1 weight
    # w = P @ (L @ U), L = l*l_mask + I, U = u*l_mask.T + diag(sign_s*exp(log_s)).
    perm = jax.random.permutation(next(ki), C)
    Pm = jnp.eye(C, dtype=jnp.float32)[perm]
    l_par = jax.random.normal(next(ki), (C, C), jnp.float32) * 0.1
    u_par = jax.random.normal(next(ki), (C, C), jnp.float32) * 0.1
    sign_s = jnp.sign(jax.random.normal(next(ki), (C,), jnp.float32))
    sign_s = jnp.where(sign_s == 0, 1.0, sign_s)
    log_s = jax.random.normal(next(ki), (C,), jnp.float32) * 0.1
    l_mask = jnp.tril(jnp.ones((C, C), jnp.float32), -1)
    L = l_par * l_mask + jnp.eye(C, dtype=jnp.float32)
    U = u_par * l_mask.T + jnp.diag(sign_s * jnp.exp(log_s))
    w_inv = Pm @ (L @ U)

    def make_subnet(it):
        return dict(
            w1=jax.random.normal(next(it), (3, 3, Cs, Cs), jnp.float32) * 0.1,
            b1=jax.random.normal(next(it), (Cs,), jnp.float32) * 0.1,
            w2=jax.random.normal(next(it), (3, 3, Cs, Cs), jnp.float32) * 0.1,
            b2=jax.random.normal(next(it), (Cs,), jnp.float32) * 0.1,
            gamma=1.0 + jax.random.normal(next(it), (half,), jnp.float32) * 0.1,
            beta=jax.random.normal(next(it), (half,), jnp.float32) * 0.1,
        )

    pf = make_subnet(ki)
    pg = make_subnet(ki)
    ph = make_subnet(ki)

    x = jax.random.normal(next(ki), (N, C, H, W), jnp.float32)

    fn = jax.jit(functools.partial(inv_block, split1=split1))
    out = fn(x, w_inv, pf, pg, ph)
    out = jax.block_until_ready(out)

    ref = inv_block_ref(x, w_inv, pf, pg, ph, split1)
    if not jnp.allclose(out, ref, rtol=1e-3, atol=1e-3):
        max_err = float(jnp.max(jnp.abs(out - ref)))
        raise AssertionError(f"kernel mismatch, max abs err = {max_err}")

    print("KERNEL_OK")
</pallas_src>

<mosaic_0001>
module attributes {stable_mosaic.version = 11 : i64} {
  func.func @kernel(%arg0: i32, %arg1: memref<1x8x256xf32, #tpu.memory_space<vmem>>, %arg2: memref<8x8xf32, #tpu.memory_space<vmem>>, %arg3: memref<9x256xf32, #tpu.memory_space<vmem>>, %arg4: memref<3x4x36xf32, #tpu.memory_space<vmem>>, %arg5: memref<3x4x1xf32, #tpu.memory_space<vmem>>, %arg6: memref<3x4x36xf32, #tpu.memory_space<vmem>>, %arg7: memref<3x4x1xf32, #tpu.memory_space<vmem>>, %arg8: memref<3x2x1xf32, #tpu.memory_space<vmem>>, %arg9: memref<3x2x1xf32, #tpu.memory_space<vmem>>, %arg10: memref<1x8x256xf32, #tpu.memory_space<vmem>>, %arg11: memref<36x256xf32, #tpu.memory_space<vmem>>) attributes {dimension_semantics = [#tpu.dimension_semantics<parallel>], iteration_bounds = array<i64: 2>, scalar_prefetch = 0 : i64, scratch_operands = 1 : i64, tpu.core_type = #tpu.core_type<tc>, window_params = [{transform_indices = @transform_0, window_bounds = array<i64: 1, 8, 256>}, {pipeline_mode = #tpu.pipeline_mode<synchronous>, transform_indices = @transform_1, window_bounds = array<i64: 8, 8>}, {pipeline_mode = #tpu.pipeline_mode<synchronous>, transform_indices = @transform_2, window_bounds = array<i64: 9, 256>}, {pipeline_mode = #tpu.pipeline_mode<synchronous>, transform_indices = @transform_3, window_bounds = array<i64: 3, 4, 36>}, {pipeline_mode = #tpu.pipeline_mode<synchronous>, transform_indices = @transform_4, window_bounds = array<i64: 3, 4, 1>}, {pipeline_mode = #tpu.pipeline_mode<synchronous>, transform_indices = @transform_5, window_bounds = array<i64: 3, 4, 36>}, {pipeline_mode = #tpu.pipeline_mode<synchronous>, transform_indices = @transform_6, window_bounds = array<i64: 3, 4, 1>}, {pipeline_mode = #tpu.pipeline_mode<synchronous>, transform_indices = @transform_7, window_bounds = array<i64: 3, 2, 1>}, {pipeline_mode = #tpu.pipeline_mode<synchronous>, transform_indices = @transform_8, window_bounds = array<i64: 3, 2, 1>}, {transform_indices = @transform_9, window_bounds = array<i64: 1, 8, 256>}]} {
    %c0 = arith.constant 0 : index
    %c0_0 = arith.constant 0 : index
    %c0_1 = arith.constant 0 : index
    %0 = vector.load %arg1[%c0, %c0_0, %c0_1] : memref<1x8x256xf32, #tpu.memory_space<vmem>>, vector<1x8x256xf32>
    %1 = vector.shape_cast %0 : vector<1x8x256xf32> to vector<8x256xf32>
    %c0_2 = arith.constant 0 : index
    %c0_3 = arith.constant 0 : index
    %2 = vector.load %arg2[%c0_2, %c0_3] : memref<8x8xf32, #tpu.memory_space<vmem>>, vector<8x8xf32>
    %cst = arith.constant dense<0.000000e+00> : vector<8x256xf32>
    %3 = tpu.matmul %2, %1, %cst {dimension_numbers = #tpu.dot_dimension_numbers<[1], [0], [0], [1], [0, 0, 1, 1], [], []>} : vector<8x8xf32>, vector<8x256xf32>, vector<8x256xf32> -> vector<8x256xf32>
    %4 = vector.extract_strided_slice %3 {offsets = [0, 0], sizes = [4, 256], strides = [1, 1]} : vector<8x256xf32> to vector<4x256xf32>
    %5 = vector.extract_strided_slice %3 {offsets = [4, 0], sizes = [4, 256], strides = [1, 1]} : vector<8x256xf32> to vector<4x256xf32>
    %c0_4 = arith.constant 0 : index
    %c0_5 = arith.constant 0 : index
    %c0_6 = arith.constant 0 : index
    %6 = vector.load %arg4[%c0_4, %c0_5, %c0_6] : memref<3x4x36xf32, #tpu.memory_space<vmem>>, vector<1x4x36xf32>
    %7 = vector.shape_cast %6 : vector<1x4x36xf32> to vector<4x36xf32>
    %c0_7 = arith.constant 0 : index
    %c0_8 = arith.constant 0 : index
    %c0_9 = arith.constant 0 : index
    %8 = vector.load %arg5[%c0_7, %c0_8, %c0_9] : memref<3x4x1xf32, #tpu.memory_space<vmem>>, vector<1x4x1xf32>
    %9 = vector.shape_cast %8 : vector<1x4x1xf32> to vector<4x1xf32>
    %c0_10 = arith.constant 0 : index
    %c0_11 = arith.constant 0 : index
    %c0_12 = arith.constant 0 : index
    %10 = vector.load %arg6[%c0_10, %c0_11, %c0_12] : memref<3x4x36xf32, #tpu.memory_space<vmem>>, vector<1x4x36xf32>
    %11 = vector.shape_cast %10 : vector<1x4x36xf32> to vector<4x36xf32>
    %c0_13 = arith.constant 0 : index
    %c0_14 = arith.constant 0 : index
    %c0_15 = arith.constant 0 : index
    %12 = vector.load %arg7[%c0_13, %c0_14, %c0_15] : memref<3x4x1xf32, #tpu.memory_space<vmem>>, vector<1x4x1xf32>
    %13 = vector.shape_cast %12 : vector<1x4x1xf32> to vector<4x1xf32>
    %c0_16 = arith.constant 0 : index
    %c0_17 = arith.constant 0 : index
    %c0_18 = arith.constant 0 : index
    %14 = vector.load %arg8[%c0_16, %c0_17, %c0_18] : memref<3x2x1xf32, #tpu.memory_space<vmem>>, vector<1x2x1xf32>
    %15 = vector.shape_cast %14 : vector<1x2x1xf32> to vector<2x1xf32>
    %c0_19 = arith.constant 0 : index
    %c0_20 = arith.constant 0 : index
    %c0_21 = arith.constant 0 : index
    %16 = vector.load %arg9[%c0_19, %c0_20, %c0_21] : memref<3x2x1xf32, #tpu.memory_space<vmem>>, vector<1x2x1xf32>
    %17 = vector.shape_cast %16 : vector<1x2x1xf32> to vector<2x1xf32>
    %c17_i32 = arith.constant 17 : i32
    %18 = tpu.dynamic_rotate %5 by %c17_i32 dim 1 : vector<4x256xf32>, i32 -> vector<4x256xf32>
    %c0_22 = arith.constant 0 : index
    %c0_23 = arith.constant 0 : index
    %19 = vector.load %arg3[%c0_22, %c0_23] : memref<9x256xf32, #tpu.memory_space<vmem>>, vector<1x256xf32>
    %20 = vector.broadcast %19 : vector<1x256xf32> to vector<4x256xf32>
    %21 = arith.mulf %18, %20 : vector<4x256xf32>
    %c0_24 = arith.constant 0 : index
    %c0_25 = arith.constant 0 : index
    %22 = vector.load %arg11[%c0_24, %c0_25] : memref<36x256xf32, #tpu.memory_space<vmem>>, vector<4x256xf32>
    tpu.vector_store %arg11[%c0_24, %c0_25], %21 {strides = array<i32>} : memref<36x256xf32, #tpu.memory_space<vmem>>, vector<4x256xf32>,
    %c16_i32 = arith.constant 16 : i32
    %23 = tpu.dynamic_rotate %5 by %c16_i32 dim 1 : vector<4x256xf32>, i32 -> vector<4x256xf32>
    %c1 = arith.constant 1 : index
    %c0_26 = arith.constant 0 : index
    %24 = vector.load %arg3[%c1, %c0_26] : memref<9x256xf32, #tpu.memory_space<vmem>>, vector<1x256xf32>
    %25 = vector.broadcast %24 : vector<1x256xf32> to vector<4x256xf32>
    %26 = arith.mulf %23, %25 : vector<4x256xf32>
    %c4 = arith.constant 4 : index
    %c0_27 = arith.constant 0 : index
    %27 = vector.load %arg11[%c4, %c0_27] : memref<36x256xf32, #tpu.memory_space<vmem>>, vector<4x256xf32>
    tpu.vector_store %arg11[%c4, %c0_27], %26 {strides = array<i32>} : memref<36x256xf32, #tpu.memory_space<vmem>>, vector<4x256xf32>,
    %c15_i32 = arith.constant 15 : i32
    %28 = tpu.dynamic_rotate %5 by %c15_i32 dim 1 : vector<4x256xf32>, i32 -> vector<4x256xf32>
    %c2 = arith.constant 2 : index
    %c0_28 = arith.constant 0 : index
    %29 = vector.load %arg3[%c2, %c0_28] : memref<9x256xf32, #tpu.memory_space<vmem>>, vector<1x256xf32>
    %30 = vector.broadcast %29 : vector<1x256xf32> to vector<4x256xf32>
    %31 = arith.mulf %28, %30 : vector<4x256xf32>
    %c8 = arith.constant 8 : index
    %c0_29 = arith.constant 0 : index
    %32 = vector.load %arg11[%c8, %c0_29] : memref<36x256xf32, #tpu.memory_space<vmem>>, vector<4x256xf32>
    tpu.vector_store %arg11[%c8, %c0_29], %31 {strides = array<i32>} : memref<36x256xf32, #tpu.memory_space<vmem>>, vector<4x256xf32>,
    %c1_i32 = arith.constant 1 : i32
    %33 = tpu.dynamic_rotate %5 by %c1_i32 dim 1 : vector<4x256xf32>, i32 -> vector<4x256xf32>
    %c3 = arith.constant 3 : index
    %c0_30 = arith.constant 0 : index
    %34 = vector.load %arg3[%c3, %c0_30] : memref<9x256xf32, #tpu.memory_space<vmem>>, vector<1x256xf32>
    %35 = vector.broadcast %34 : vector<1x256xf32> to vector<4x256xf32>
    %36 = arith.mulf %33, %35 : vector<4x256xf32>
    %c12 = arith.constant 12 : index
    %c0_31 = arith.constant 0 : index
    %37 = vector.load %arg11[%c12, %c0_31] : memref<36x256xf32, #tpu.memory_space<vmem>>, vector<4x256xf32>
    tpu.vector_store %arg11[%c12, %c0_31], %36 {strides = array<i32>} : memref<36x256xf32, #tpu.memory_space<vmem>>, vector<4x256xf32>,
    %c16 = arith.constant 16 : index
    %c0_32 = arith.constant 0 : index
    %38 = vector.load %arg11[%c16, %c0_32] : memref<36x256xf32, #tpu.memory_space<vmem>>, vector<4x256xf32>
    tpu.vector_store %arg11[%c16, %c0_32], %5 {strides = array<i32>} : memref<36x256xf32, #tpu.memory_space<vmem>>, vector<4x256xf32>,
    %c255_i32 = arith.constant 255 : i32
    %39 = tpu.dynamic_rotate %5 by %c255_i32 dim 1 : vector<4x256xf32>, i32 -> vector<4x256xf32>
    %c5 = arith.constant 5 : index
    %c0_33 = arith.constant 0 : index
    %40 = vector.load %arg3[%c5, %c0_33] : memref<9x256xf32, #tpu.memory_space<vmem>>, vector<1x256xf32>
    %41 = vector.broadcast %40 : vector<1x256xf32> to vector<4x256xf32>
    %42 = arith.mulf %39, %41 : vector<4x256xf32>
    %c20 = arith.constant 20 : index
    %c0_34 = arith.constant 0 : index
    %43 = vector.load %arg11[%c20, %c0_34] : memref<36x256xf32, #tpu.memory_space<vmem>>, vector<4x256xf32>
    tpu.vector_store %arg11[%c20, %c0_34], %42 {strides = array<i32>} : memref<36x256xf32, #tpu.memory_space<vmem>>, vector<4x256xf32>,
    %c241_i32 = arith.constant 241 : i32
    %44 = tpu.dynamic_rotate %5 by %c241_i32 dim 1 : vector<4x256xf32>, i32 -> vector<4x256xf32>
    %c6 = arith.constant 6 : index
    %c0_35 = arith.constant 0 : index
    %45 = vector.load %arg3[%c6, %c0_35] : memref<9x256xf32, #tpu.memory_space<vmem>>, vector<1x256xf32>
    %46 = vector.broadcast %45 : vector<1x256xf32> to vector<4x256xf32>
    %47 = arith.mulf %44, %46 : vector<4x256xf32>
    %c24 = arith.constant 24 : index
    %c0_36 = arith.constant 0 : index
    %48 = vector.load %arg11[%c24, %c0_36] : memref<36x256xf32, #tpu.memory_space<vmem>>, vector<4x256xf32>
    tpu.vector_store %arg11[%c24, %c0_36], %47 {strides = array<i32>} : memref<36x256xf32, #tpu.memory_space<vmem>>, vector<4x256xf32>,
    %c240_i32 = arith.constant 240 : i32
    %49 = tpu.dynamic_rotate %5 by %c240_i32 dim 1 : vector<4x256xf32>, i32 -> vector<4x256xf32>
    %c7 = arith.constant 7 : index
    %c0_37 = arith.constant 0 : index
    %50 = vector.load %arg3[%c7, %c0_37] : memref<9x256xf32, #tpu.memory_space<vmem>>, vector<1x256xf32>
    %51 = vector.broadcast %50 : vector<1x256xf32> to vector<4x256xf32>
    %52 = arith.mulf %49, %51 : vector<4x256xf32>
    %c28 = arith.constant 28 : index
    %c0_38 = arith.constant 0 : index
    %53 = vector.load %arg11[%c28, %c0_38] : memref<36x256xf32, #tpu.memory_space<vmem>>, vector<4x256xf32>
    tpu.vector_store %arg11[%c28, %c0_38], %52 {strides = array<i32>} : memref<36x256xf32, #tpu.memory_space<vmem>>, vector<4x256xf32>,
    %c239_i32 = arith.constant 239 : i32
    %54 = tpu.dynamic_rotate %5 by %c239_i32 dim 1 : vector<4x256xf32>, i32 -> vector<4x256xf32>
    %c8_39 = arith.constant 8 : index
    %c0_40 = arith.constant 0 : index
    %55 = vector.load %arg3[%c8_39, %c0_40] : memref<9x256xf32, #tpu.memory_space<vmem>>, vector<1x256xf32>
    %56 = vector.broadcast %55 : vector<1x256xf32> to vector<4x256xf32>
    %57 = arith.mulf %54, %56 : vector<4x256xf32>
    %c32 = arith.constant 32 : index
    %c0_41 = arith.constant 0 : index
    %58 = vector.load %arg11[%c32, %c0_41] : memref<36x256xf32, #tpu.memory_space<vmem>>, vector<4x256xf32>
    tpu.vector_store %arg11[%c32, %c0_41], %57 {strides = array<i32>} : memref<36x256xf32, #tpu.memory_space<vmem>>, vector<4x256xf32>,
    %c0_42 = arith.constant 0 : index
    %c0_43 = arith.constant 0 : index
    %59 = vector.load %arg11[%c0_42, %c0_43] : memref<36x256xf32, #tpu.memory_space<vmem>>, vector<36x256xf32>
    %cst_44 = arith.constant dense<0.000000e+00> : vector<4x256xf32>
    %60 = tpu.matmul %7, %59, %cst_44 {dimension_numbers = #tpu.dot_dimension_numbers<[1], [0], [0], [1], [0, 0, 1, 1], [], []>} : vector<4x36xf32>, vector<36x256xf32>, vector<4x256xf32> -> vector<4x256xf32>
    %61 = vector.broadcast %9 : vector<4x1xf32> to vector<4x256xf32>
    %62 = arith.addf %60, %61 : vector<4x256xf32>
    %cst_45 = arith.constant 0.000000e+00 : f32
    %63 = vector.broadcast %cst_45 : f32 to vector<4x256xf32>
    %64 = arith.cmpf ogt, %62, %63 : vector<4x256xf32>
    %cst_46 = arith.constant 2.000000e-01 : f32
    %65 = vector.broadcast %cst_46 : f32 to vector<4x256xf32>
    %66 = arith.mulf %65, %62 : vector<4x256xf32>
    %67 = arith.select %64, %62, %66 : vector<4x256xi1>, vector<4x256xf32>
    %68 = vector.extract_strided_slice %67 {offsets = [0, 0], sizes = [2, 256], strides = [1, 1]} : vector<4x256xf32> to vector<2x256xf32>
    %cst_47 = arith.constant dense<0.000000e+00> : vector<2xf32>
    %69 = vector.multi_reduction <add>, %68, %cst_47 [1] : vector<2x256xf32> to vector<2xf32>
    %70 = vector.shape_cast %69 : vector<2xf32> to vector<2x1xf32>
    %cst_48 = arith.constant 2.560000e+02 : f32
    %71 = vector.broadcast %cst_48 : f32 to vector<2x1xf32>
    %72 = arith.divf %70, %71 : vector<2x1xf32>
    %73 = arith.mulf %68, %68 : vector<2x256xf32>
    %cst_49 = arith.constant dense<0.000000e+00> : vector<2xf32>
    %74 = vector.multi_reduction <add>, %73, %cst_49 [1] : vector<2x256xf32> to vector<2xf32>
    %75 = vector.shape_cast %74 : vector<2xf32> to vector<2x1xf32>
    %cst_50 = arith.constant 2.560000e+02 : f32
    %76 = vector.broadcast %cst_50 : f32 to vector<2x1xf32>
    %77 = arith.divf %75, %76 : vector<2x1xf32>
    %78 = arith.mulf %72, %72 : vector<2x1xf32>
    %79 = arith.subf %77, %78 : vector<2x1xf32>
    %80 = vector.broadcast %72 : vector<2x1xf32> to vector<2x256xf32>
    %81 = arith.subf %68, %80 : vector<2x256xf32>
    %cst_51 = arith.constant 9.99999974E-6 : f32
    %82 = vector.broadcast %cst_51 : f32 to vector<2x1xf32>
    %83 = arith.addf %79, %82 : vector<2x1xf32>
    %84 = math.rsqrt %83 : vector<2x1xf32>
    %85 = vector.broadcast %84 : vector<2x1xf32> to vector<2x256xf32>
    %86 = arith.mulf %81, %85 : vector<2x256xf32>
    %87 = vector.broadcast %15 : vector<2x1xf32> to vector<2x256xf32>
    %88 = arith.mulf %86, %87 : vector<2x256xf32>
    %89 = vector.broadcast %17 : vector<2x1xf32> to vector<2x256xf32>
    %90 = arith.addf %88, %89 : vector<2x256xf32>
    %91 = vector.extract_strided_slice %67 {offsets = [2, 0], sizes = [2, 256], strides = [1, 1]} : vector<4x256xf32> to vector<2x256xf32>
    %92 = tpu.concatenate %90, %91 in 0 : vector<2x256xf32>, vector<2x256xf32> -> vector<4x256xf32>
    %c17_i32_52 = arith.constant 17 : i32
    %93 = tpu.dynamic_rotate %92 by %c17_i32_52 dim 1 : vector<4x256xf32>, i32 -> vector<4x256xf32>
    %c0_53 = arith.constant 0 : index
    %c0_54 = arith.constant 0 : index
    %94 = vector.load %arg3[%c0_53, %c0_54] : memref<9x256xf32, #tpu.memory_space<vmem>>, vector<1x256xf32>
    %95 = vector.broadcast %94 : vector<1x256xf32> to vector<4x256xf32>
    %96 = arith.mulf %93, %95 : vector<4x256xf32>
    %c0_55 = arith.constant 0 : index
    %c0_56 = arith.constant 0 : index
    %97 = vector.load %arg11[%c0_55, %c0_56] : memref<36x256xf32, #tpu.memory_space<vmem>>, vector<4x256xf32>
    tpu.vector_store %arg11[%c0_55, %c0_56], %96 {strides = array<i32>} : memref<36x256xf32, #tpu.memory_space<vmem>>, vector<4x256xf32>,
    %c16_i32_57 = arith.constant 16 : i32
    %98 = tpu.dynamic_rotate %92 by %c16_i32_57 dim 1 : vector<4x256xf32>, i32 -> vector<4x256xf32>
    %c1_58 = arith.constant 1 : index
    %c0_59 = arith.constant 0 : index
    %99 = vector.load %arg3[%c1_58, %c0_59] : memref<9x256xf32, #tpu.memory_space<vmem>>, vector<1x256xf32>
    %100 = vector.broadcast %99 : vector<1x256xf32> to vector<4x256xf32>
    %101 = arith.mulf %98, %100 : vector<4x256xf32>
    %c4_60 = arith.constant 4 : index
    %c0_61 = arith.constant 0 : index
    %102 = vector.load %arg11[%c4_60, %c0_61] : memref<36x256xf32, #tpu.memory_space<vmem>>, vector<4x256xf32>
    tpu.vector_store %arg11[%c4_60, %c0_61], %101 {strides = array<i32>} : memref<36x256xf32, #tpu.memory_space<vmem>>, vector<4x256xf32>,
    %c15_i32_62 = arith.constant 15 : i32
    %103 = tpu.dynamic_rotate %92 by %c15_i32_62 dim 1 : vector<4x256xf32>, i32 -> vector<4x256xf32>
    %c2_63 = arith.constant 2 : index
    %c0_64 = arith.constant 0 : index
    %104 = vector.load %arg3[%c2_63, %c0_64] : memref<9x256xf32, #tpu.memory_space<vmem>>, vector<1x256xf32>
    %105 = vector.broadcast %104 : vector<1x256xf32> to vector<4x256xf32>
    %106 = arith.mulf %103, %105 : vector<4x256xf32>
    %c8_65 = arith.constant 8 : index
    %c0_66 = arith.constant 0 : index
    %107 = vector.load %arg11[%c8_65, %c0_66] : memref<36x256xf32, #tpu.memory_space<vmem>>, vector<4x256xf32>
    tpu.vector_store %arg11[%c8_65, %c0_66], %106 {strides = array<i32>} : memref<36x256xf32, #tpu.memory_space<vmem>>, vector<4x256xf32>,
    %c1_i32_67 = arith.constant 1 : i32
    %108 = tpu.dynamic_rotate %92 by %c1_i32_67 dim 1 : vector<4x256xf32>, i32 -> vector<4x256xf32>
    %c3_68 = arith.constant 3 : index
    %c0_69 = arith.constant 0 : index
    %109 = vector.load %arg3[%c3_68, %c0_69] : memref<9x256xf32, #tpu.memory_space<vmem>>, vector<1x256xf32>
    %110 = vector.broadcast %109 : vector<1x256xf32> to vector<4x256xf32>
    %111 = arith.mulf %108, %110 : vector<4x256xf32>
    %c12_70 = arith.constant 12 : index
    %c0_71 = arith.constant 0 : index
    %112 = vector.load %arg11[%c12_70, %c0_71] : memref<36x256xf32, #tpu.memory_space<vmem>>, vector<4x256xf32>
    tpu.vector_store %arg11[%c12_70, %c0_71], %111 {strides = array<i32>} : memref<36x256xf32, #tpu.memory_space<vmem>>, vector<4x256xf32>,
    %c16_72 = arith.constant 16 : index
    %c0_73 = arith.constant 0 : index
    %113 = vector.load %arg11[%c16_72, %c0_73] : memref<36x256xf32, #tpu.memory_space<vmem>>, vector<4x256xf32>
    tpu.vector_store %arg11[%c16_72, %c0_73], %92 {strides = array<i32>} : memref<36x256xf32, #tpu.memory_space<vmem>>, vector<4x256xf32>,
    %c255_i32_74 = arith.constant 255 : i32
    %114 = tpu.dynamic_rotate %92 by %c255_i32_74 dim 1 : vector<4x256xf32>, i32 -> vector<4x256xf32>
    %c5_75 = arith.constant 5 : index
    %c0_76 = arith.constant 0 : index
    %115 = vector.load %arg3[%c5_75, %c0_76] : memref<9x256xf32, #tpu.memory_space<vmem>>, vector<1x256xf32>
    %116 = vector.broadcast %115 : vector<1x256xf32> to vector<4x256xf32>
    %117 = arith.mulf %114, %116 : vector<4x256xf32>
    %c20_77 = arith.constant 20 : index
    %c0_78 = arith.constant 0 : index
    %118 = vector.load %arg11[%c20_77, %c0_78] : memref<36x256xf32, #tpu.memory_space<vmem>>, vector<4x256xf32>
    tpu.vector_store %arg11[%c20_77, %c0_78], %117 {strides = array<i32>} : memref<36x256xf32, #tpu.memory_space<vmem>>, vector<4x256xf32>,
    %c241_i32_79 = arith.constant 241 : i32
    %119 = tpu.dynamic_rotate %92 by %c241_i32_79 dim 1 : vector<4x256xf32>, i32 -> vector<4x256xf32>
    %c6_80 = arith.constant 6 : index
    %c0_81 = arith.constant 0 : index
    %120 = vector.load %arg3[%c6_80, %c0_81] : memref<9x256xf32, #tpu.memory_space<vmem>>, vector<1x256xf32>
    %121 = vector.broadcast %120 : vector<1x256xf32> to vector<4x256xf32>
    %122 = arith.mulf %119, %121 : vector<4x256xf32>
    %c24_82 = arith.constant 24 : index
    %c0_83 = arith.constant 0 : index
    %123 = vector.load %arg11[%c24_82, %c0_83] : memref<36x256xf32, #tpu.memory_space<vmem>>, vector<4x256xf32>
    tpu.vector_store %arg11[%c24_82, %c0_83], %122 {strides = array<i32>} : memref<36x256xf32, #tpu.memory_space<vmem>>, vector<4x256xf32>,
    %c240_i32_84 = arith.constant 240 : i32
    %124 = tpu.dynamic_rotate %92 by %c240_i32_84 dim 1 : vector<4x256xf32>, i32 -> vector<4x256xf32>
    %c7_85 = arith.constant 7 : index
    %c0_86 = arith.constant 0 : index
    %125 = vector.load %arg3[%c7_85, %c0_86] : memref<9x256xf32, #tpu.memory_space<vmem>>, vector<1x256xf32>
    %126 = vector.broadcast %125 : vector<1x256xf32> to vector<4x256xf32>
    %127 = arith.mulf %124, %126 : vector<4x256xf32>
    %c28_87 = arith.constant 28 : index
    %c0_88 = arith.constant 0 : index
    %128 = vector.load %arg11[%c28_87, %c0_88] : memref<36x256xf32, #tpu.memory_space<vmem>>, vector<4x256xf32>
    tpu.vector_store %arg11[%c28_87, %c0_88], %127 {strides = array<i32>} : memref<36x256xf32, #tpu.memory_space<vmem>>, vector<4x256xf32>,
    %c239_i32_89 = arith.constant 239 : i32
    %129 = tpu.dynamic_rotate %92 by %c239_i32_89 dim 1 : vector<4x256xf32>, i32 -> vector<4x256xf32>
    %c8_90 = arith.constant 8 : index
    %c0_91 = arith.constant 0 : index
    %130 = vector.load %arg3[%c8_90, %c0_91] : memref<9x256xf32, #tpu.memory_space<vmem>>, vector<1x256xf32>
    %131 = vector.broadcast %130 : vector<1x256xf32> to vector<4x256xf32>
    %132 = arith.mulf %129, %131 : vector<4x256xf32>
    %c32_92 = arith.constant 32 : index
    %c0_93 = arith.constant 0 : index
    %133 = vector.load %arg11[%c32_92, %c0_93] : memref<36x256xf32, #tpu.memory_space<vmem>>, vector<4x256xf32>
    tpu.vector_store %arg11[%c32_92, %c0_93], %132 {strides = array<i32>} : memref<36x256xf32, #tpu.memory_space<vmem>>, vector<4x256xf32>,
    %c0_94 = arith.constant 0 : index
    %c0_95 = arith.constant 0 : index
    %134 = vector.load %arg11[%c0_94, %c0_95] : memref<36x256xf32, #tpu.memory_space<vmem>>, vector<36x256xf32>
    %cst_96 = arith.constant dense<0.000000e+00> : vector<4x256xf32>
    %135 = tpu.matmul %11, %134, %cst_96 {dimension_numbers = #tpu.dot_dimension_numbers<[1], [0], [0], [1], [0, 0, 1, 1], [], []>} : vector<4x36xf32>, vector<36x256xf32>, vector<4x256xf32> -> vector<4x256xf32>
    %136 = vector.broadcast %13 : vector<4x1xf32> to vector<4x256xf32>
    %137 = arith.addf %135, %136 : vector<4x256xf32>
    %cst_97 = arith.constant 0.000000e+00 : f32
    %138 = vector.broadcast %cst_97 : f32 to vector<4x256xf32>
    %139 = arith.cmpf ogt, %137, %138 : vector<4x256xf32>
    %cst_98 = arith.constant 2.000000e-01 : f32
    %140 = vector.broadcast %cst_98 : f32 to vector<4x256xf32>
    %141 = arith.mulf %140, %137 : vector<4x256xf32>
    %142 = arith.select %139, %137, %141 : vector<4x256xi1>, vector<4x256xf32>
    %143 = arith.addf %5, %142 : vector<4x256xf32>
    %144 = arith.addf %4, %143 : vector<4x256xf32>
    %c2_99 = arith.constant 2 : index
    %c0_100 = arith.constant 0 : index
    %c0_101 = arith.constant 0 : index
    %145 = vector.load %arg4[%c2_99, %c0_100, %c0_101] : memref<3x4x36xf32, #tpu.memory_space<vmem>>, vector<1x4x36xf32>
    %146 = vector.shape_cast %145 : vector<1x4x36xf32> to vector<4x36xf32>
    %c2_102 = arith.constant 2 : index
    %c0_103 = arith.constant 0 : index
    %c0_104 = arith.constant 0 : index
    %147 = vector.load %arg5[%c2_102, %c0_103, %c0_104] : memref<3x4x1xf32, #tpu.memory_space<vmem>>, vector<1x4x1xf32>
    %148 = vector.shape_cast %147 : vector<1x4x1xf32> to vector<4x1xf32>
    %c2_105 = arith.constant 2 : index
    %c0_106 = arith.constant 0 : index
    %c0_107 = arith.constant 0 : index
    %149 = vector.load %arg6[%c2_105, %c0_106, %c0_107] : memref<3x4x36xf32, #tpu.memory_space<vmem>>, vector<1x4x36xf32>
    %150 = vector.shape_cast %149 : vector<1x4x36xf32> to vector<4x36xf32>
    %c2_108 = arith.constant 2 : index
    %c0_109 = arith.constant 0 : index
    %c0_110 = arith.constant 0 : index
    %151 = vector.load %arg7[%c2_108, %c0_109, %c0_110] : memref<3x4x1xf32, #tpu.memory_space<vmem>>, vector<1x4x1xf32>
    %152 = vector.shape_cast %151 : vector<1x4x1xf32> to vector<4x1xf32>
    %c2_111 = arith.constant 2 : index
    %c0_112 = arith.constant 0 : index
    %c0_113 = arith.constant 0 : index
    %153 = vector.load %arg8[%c2_111, %c0_112, %c0_113] : memref<3x2x1xf32, #tpu.memory_space<vmem>>, vector<1x2x1xf32>
    %154 = vector.shape_cast %153 : vector<1x2x1xf32> to vector<2x1xf32>
    %c2_114 = arith.constant 2 : index
    %c0_115 = arith.constant 0 : index
    %c0_116 = arith.constant 0 : index
    %155 = vector.load %arg9[%c2_114, %c0_115, %c0_116] : memref<3x2x1xf32, #tpu.memory_space<vmem>>, vector<1x2x1xf32>
    %156 = vector.shape_cast %155 : vector<1x2x1xf32> to vector<2x1xf32>
    %c17_i32_117 = arith.constant 17 : i32
    %157 = tpu.dynamic_rotate %144 by %c17_i32_117 dim 1 : vector<4x256xf32>, i32 -> vector<4x256xf32>
    %c0_118 = arith.constant 0 : index
    %c0_119 = arith.constant 0 : index
    %158 = vector.load %arg3[%c0_118, %c0_119] : memref<9x256xf32, #tpu.memory_space<vmem>>, vector<1x256xf32>
    %159 = vector.broadcast %158 : vector<1x256xf32> to vector<4x256xf32>
    %160 = arith.mulf %157, %159 : vector<4x256xf32>
    %c0_120 = arith.constant 0 : index
    %c0_121 = arith.constant 0 : index
    %161 = vector.load %arg11[%c0_120, %c0_121] : memref<36x256xf32, #tpu.memory_space<vmem>>, vector<4x256xf32>
    tpu.vector_store %arg11[%c0_120, %c0_121], %160 {strides = array<i32>} : memref<36x256xf32, #tpu.memory_space<vmem>>, vector<4x256xf32>,
    %c16_i32_122 = arith.constant 16 : i32
    %162 = tpu.dynamic_rotate %144 by %c16_i32_122 dim 1 : vector<4x256xf32>, i32 -> vector<4x256xf32>
    %c1_123 = arith.constant 1 : index
    %c0_124 = arith.constant 0 : index
    %163 = vector.load %arg3[%c1_123, %c0_124] : memref<9x256xf32, #tpu.memory_space<vmem>>, vector<1x256xf32>
    %164 = vector.broadcast %163 : vector<1x256xf32> to vector<4x256xf32>
    %165 = arith.mulf %162, %164 : vector<4x256xf32>
    %c4_125 = arith.constant 4 : index
    %c0_126 = arith.constant 0 : index
    %166 = vector.load %arg11[%c4_125, %c0_126] : memref<36x256xf32, #tpu.memory_space<vmem>>, vector<4x256xf32>
    tpu.vector_store %arg11[%c4_125, %c0_126], %165 {strides = array<i32>} : memref<36x256xf32, #tpu.memory_space<vmem>>, vector<4x256xf32>,
    %c15_i32_127 = arith.constant 15 : i32
    %167 = tpu.dynamic_rotate %144 by %c15_i32_127 dim 1 : vector<4x256xf32>, i32 -> vector<4x256xf32>
    %c2_128 = arith.constant 2 : index
    %c0_129 = arith.constant 0 : index
    %168 = vector.load %arg3[%c2_128, %c0_129] : memref<9x256xf32, #tpu.memory_space<vmem>>, vector<1x256xf32>
    %169 = vector.broadcast %168 : vector<1x256xf32> to vector<4x256xf32>
    %170 = arith.mulf %167, %169 : vector<4x256xf32>
    %c8_130 = arith.constant 8 : index
    %c0_131 = arith.constant 0 : index
    %171 = vector.load %arg11[%c8_130, %c0_131] : memref<36x256xf32, #tpu.memory_space<vmem>>, vector<4x256xf32>
    tpu.vector_store %arg11[%c8_130, %c0_131], %170 {strides = array<i32>} : memref<36x256xf32, #tpu.memory_space<vmem>>, vector<4x256xf32>,
    %c1_i32_132 = arith.constant 1 : i32
    %172 = tpu.dynamic_rotate %144 by %c1_i32_132 dim 1 : vector<4x256xf32>, i32 -> vector<4x256xf32>
    %c3_133 = arith.constant 3 : index
    %c0_134 = arith.constant 0 : index
    %173 = vector.load %arg3[%c3_133, %c0_134] : memref<9x256xf32, #tpu.memory_space<vmem>>, vector<1x256xf32>
    %174 = vector.broadcast %173 : vector<1x256xf32> to vector<4x256xf32>
    %175 = arith.mulf %172, %174 : vector<4x256xf32>
    %c12_135 = arith.constant 12 : index
    %c0_136 = arith.constant 0 : index
    %176 = vector.load %arg11[%c12_135, %c0_136] : memref<36x256xf32, #tpu.memory_space<vmem>>, vector<4x256xf32>
    tpu.vector_store %arg11[%c12_135, %c0_136], %175 {strides = array<i32>} : memref<36x256xf32, #tpu.memory_space<vmem>>, vector<4x256xf32>,
    %c16_137 = arith.constant 16 : index
    %c0_138 = arith.constant 0 : index
    %177 = vector.load %arg11[%c16_137, %c0_138] : memref<36x256xf32, #tpu.memory_space<vmem>>, vector<4x256xf32>
    tpu.vector_store %arg11[%c16_137, %c0_138], %144 {strides = array<i32>} : memref<36x256xf32, #tpu.memory_space<vmem>>, vector<4x256xf32>,
    %c255_i32_139 = arith.constant 255 : i32
    %178 = tpu.dynamic_rotate %144 by %c255_i32_139 dim 1 : vector<4x256xf32>, i32 -> vector<4x256xf32>
    %c5_140 = arith.constant 5 : index
    %c0_141 = arith.constant 0 : index
    %179 = vector.load %arg3[%c5_140, %c0_141] : memref<9x256xf32, #tpu.memory_space<vmem>>, vector<1x256xf32>
    %180 = vector.broadcast %179 : vector<1x256xf32> to vector<4x256xf32>
    %181 = arith.mulf %178, %180 : vector<4x256xf32>
    %c20_142 = arith.constant 20 : index
    %c0_143 = arith.constant 0 : index
    %182 = vector.load %arg11[%c20_142, %c0_143] : memref<36x256xf32, #tpu.memory_space<vmem>>, vector<4x256xf32>
    tpu.vector_store %arg11[%c20_142, %c0_143], %181 {strides = array<i32>} : memref<36x256xf32, #tpu.memory_space<vmem>>, vector<4x256xf32>,
    %c241_i32_144 = arith.constant 241 : i32
    %183 = tpu.dynamic_rotate %144 by %c241_i32_144 dim 1 : vector<4x256xf32>, i32 -> vector<4x256xf32>
    %c6_145 = arith.constant 6 : index
    %c0_146 = arith.constant 0 : index
    %184 = vector.load %arg3[%c6_145, %c0_146] : memref<9x256xf32, #tpu.memory_space<vmem>>, vector<1x256xf32>
    %185 = vector.broadcast %184 : vector<1x256xf32> to vector<4x256xf32>
    %186 = arith.mulf %183, %185 : vector<4x256xf32>
    %c24_147 = arith.constant 24 : index
    %c0_148 = arith.constant 0 : index
    %187 = vector.load %arg11[%c24_147, %c0_148] : memref<36x256xf32, #tpu.memory_space<vmem>>, vector<4x256xf32>
    tpu.vector_store %arg11[%c24_147, %c0_148], %186 {strides = array<i32>} : memref<36x256xf32, #tpu.memory_space<vmem>>, vector<4x256xf32>,
    %c240_i32_149 = arith.constant 240 : i32
    %188 = tpu.dynamic_rotate %144 by %c240_i32_149 dim 1 : vector<4x256xf32>, i32 -> vector<4x256xf32>
    %c7_150 = arith.constant 7 : index
    %c0_151 = arith.constant 0 : index
    %189 = vector.load %arg3[%c7_150, %c0_151] : memref<9x256xf32, #tpu.memory_space<vmem>>, vector<1x256xf32>
    %190 = vector.broadcast %189 : vector<1x256xf32> to vector<4x256xf32>
    %191 = arith.mulf %188, %190 : vector<4x256xf32>
    %c28_152 = arith.constant 28 : index
    %c0_153 = arith.constant 0 : index
    %192 = vector.load %arg11[%c28_152, %c0_153] : memref<36x256xf32, #tpu.memory_space<vmem>>, vector<4x256xf32>
    tpu.vector_store %arg11[%c28_152, %c0_153], %191 {strides = array<i32>} : memref<36x256xf32, #tpu.memory_space<vmem>>, vector<4x256xf32>,
    %c239_i32_154 = arith.constant 239 : i32
    %193 = tpu.dynamic_rotate %144 by %c239_i32_154 dim 1 : vector<4x256xf32>, i32 -> vector<4x256xf32>
    %c8_155 = arith.constant 8 : index
    %c0_156 = arith.constant 0 : index
    %194 = vector.load %arg3[%c8_155, %c0_156] : memref<9x256xf32, #tpu.memory_space<vmem>>, vector<1x256xf32>
    %195 = vector.broadcast %194 : vector<1x256xf32> to vector<4x256xf32>
    %196 = arith.mulf %193, %195 : vector<4x256xf32>
    %c32_157 = arith.constant 32 : index
    %c0_158 = arith.constant 0 : index
    %197 = vector.load %arg11[%c32_157, %c0_158] : memref<36x256xf32, #tpu.memory_space<vmem>>, vector<4x256xf32>
    tpu.vector_store %arg11[%c32_157, %c0_158], %196 {strides = array<i32>} : memref<36x256xf32, #tpu.memory_space<vmem>>, vector<4x256xf32>,
    %c0_159 = arith.constant 0 : index
    %c0_160 = arith.constant 0 : index
    %198 = vector.load %arg11[%c0_159, %c0_160] : memref<36x256xf32, #tpu.memory_space<vmem>>, vector<36x256xf32>
    %cst_161 = arith.constant dense<0.000000e+00> : vector<4x256xf32>
    %199 = tpu.matmul %146, %198, %cst_161 {dimension_numbers = #tpu.dot_dimension_numbers<[1], [0], [0], [1], [0, 0, 1, 1], [], []>} : vector<4x36xf32>, vector<36x256xf32>, vector<4x256xf32> -> vector<4x256xf32>
    %200 = vector.broadcast %148 : vector<4x1xf32> to vector<4x256xf32>
    %201 = arith.addf %199, %200 : vector<4x256xf32>
    %cst_162 = arith.constant 0.000000e+00 : f32
    %202 = vector.broadcast %cst_162 : f32 to vector<4x256xf32>
    %203 = arith.cmpf ogt, %201, %202 : vector<4x256xf32>
    %cst_163 = arith.constant 2.000000e-01 : f32
    %204 = vector.broadcast %cst_163 : f32 to vector<4x256xf32>
    %205 = arith.mulf %204, %201 : vector<4x256xf32>
    %206 = arith.select %203, %201, %205 : vector<4x256xi1>, vector<4x256xf32>
    %207 = vector.extract_strided_slice %206 {offsets = [0, 0], sizes = [2, 256], strides = [1, 1]} : vector<4x256xf32> to vector<2x256xf32>
    %cst_164 = arith.constant dense<0.000000e+00> : vector<2xf32>
    %208 = vector.multi_reduction <add>, %207, %cst_164 [1] : vector<2x256xf32> to vector<2xf32>
    %209 = vector.shape_cast %208 : vector<2xf32> to vector<2x1xf32>
    %cst_165 = arith.constant 2.560000e+02 : f32
    %210 = vector.broadcast %cst_165 : f32 to vector<2x1xf32>
    %211 = arith.divf %209, %210 : vector<2x1xf32>
    %212 = arith.mulf %207, %207 : vector<2x256xf32>
    %cst_166 = arith.constant dense<0.000000e+00> : vector<2xf32>
    %213 = vector.multi_reduction <add>, %212, %cst_166 [1] : vector<2x256xf32> to vector<2xf32>
    %214 = vector.shape_cast %213 : vector<2xf32> to vector<2x1xf32>
    %cst_167 = arith.constant 2.560000e+02 : f32
    %215 = vector.broadcast %cst_167 : f32 to vector<2x1xf32>
    %216 = arith.divf %214, %215 : vector<2x1xf32>
    %217 = arith.mulf %211, %211 : vector<2x1xf32>
    %218 = arith.subf %216, %217 : vector<2x1xf32>
    %219 = vector.broadcast %211 : vector<2x1xf32> to vector<2x256xf32>
    %220 = arith.subf %207, %219 : vector<2x256xf32>
    %cst_168 = arith.constant 9.99999974E-6 : f32
    %221 = vector.broadcast %cst_168 : f32 to vector<2x1xf32>
    %222 = arith.addf %218, %221 : vector<2x1xf32>
    %223 = math.rsqrt %222 : vector<2x1xf32>
    %224 = vector.broadcast %223 : vector<2x1xf32> to vector<2x256xf32>
    %225 = arith.mulf %220, %224 : vector<2x256xf32>
    %226 = vector.broadcast %154 : vector<2x1xf32> to vector<2x256xf32>
    %227 = arith.mulf %225, %226 : vector<2x256xf32>
    %228 = vector.broadcast %156 : vector<2x1xf32> to vector<2x256xf32>
    %229 = arith.addf %227, %228 : vector<2x256xf32>
    %230 = vector.extract_strided_slice %206 {offsets = [2, 0], sizes = [2, 256], strides = [1, 1]} : vector<4x256xf32> to vector<2x256xf32>
    %231 = tpu.concatenate %229, %230 in 0 : vector<2x256xf32>, vector<2x256xf32> -> vector<4x256xf32>
    %c17_i32_169 = arith.constant 17 : i32
    %232 = tpu.dynamic_rotate %231 by %c17_i32_169 dim 1 : vector<4x256xf32>, i32 -> vector<4x256xf32>
    %c0_170 = arith.constant 0 : index
    %c0_171 = arith.constant 0 : index
    %233 = vector.load %arg3[%c0_170, %c0_171] : memref<9x256xf32, #tpu.memory_space<vmem>>, vector<1x256xf32>
    %234 = vector.broadcast %233 : vector<1x256xf32> to vector<4x256xf32>
    %235 = arith.mulf %232, %234 : vector<4x256xf32>
    %c0_172 = arith.constant 0 : index
    %c0_173 = arith.constant 0 : index
    %236 = vector.load %arg11[%c0_172, %c0_173] : memref<36x256xf32, #tpu.memory_space<vmem>>, vector<4x256xf32>
    tpu.vector_store %arg11[%c0_172, %c0_173], %235 {strides = array<i32>} : memref<36x256xf32, #tpu.memory_space<vmem>>, vector<4x256xf32>,
    %c16_i32_174 = arith.constant 16 : i32
    %237 = tpu.dynamic_rotate %231 by %c16_i32_174 dim 1 : vector<4x256xf32>, i32 -> vector<4x256xf32>
    %c1_175 = arith.constant 1 : index
    %c0_176 = arith.constant 0 : index
    %238 = vector.load %arg3[%c1_175, %c0_176] : memref<9x256xf32, #tpu.memory_space<vmem>>, vector<1x256xf32>
    %239 = vector.broadcast %238 : vector<1x256xf32> to vector<4x256xf32>
    %240 = arith.mulf %237, %239 : vector<4x256xf32>
    %c4_177 = arith.constant 4 : index
    %c0_178 = arith.constant 0 : index
    %241 = vector.load %arg11[%c4_177, %c0_178] : memref<36x256xf32, #tpu.memory_space<vmem>>, vector<4x256xf32>
    tpu.vector_store %arg11[%c4_177, %c0_178], %240 {strides = array<i32>} : memref<36x256xf32, #tpu.memory_space<vmem>>, vector<4x256xf32>,
    %c15_i32_179 = arith.constant 15 : i32
    %242 = tpu.dynamic_rotate %231 by %c15_i32_179 dim 1 : vector<4x256xf32>, i32 -> vector<4x256xf32>
    %c2_180 = arith.constant 2 : index
    %c0_181 = arith.constant 0 : index
    %243 = vector.load %arg3[%c2_180, %c0_181] : memref<9x256xf32, #tpu.memory_space<vmem>>, vector<1x256xf32>
    %244 = vector.broadcast %243 : vector<1x256xf32> to vector<4x256xf32>
    %245 = arith.mulf %242, %244 : vector<4x256xf32>
    %c8_182 = arith.constant 8 : index
    %c0_183 = arith.constant 0 : index
    %246 = vector.load %arg11[%c8_182, %c0_183] : memref<36x256xf32, #tpu.memory_space<vmem>>, vector<4x256xf32>
    tpu.vector_store %arg11[%c8_182, %c0_183], %245 {strides = array<i32>} : memref<36x256xf32, #tpu.memory_space<vmem>>, vector<4x256xf32>,
    %c1_i32_184 = arith.constant 1 : i32
    %247 = tpu.dynamic_rotate %231 by %c1_i32_184 dim 1 : vector<4x256xf32>, i32 -> vector<4x256xf32>
    %c3_185 = arith.constant 3 : index
    %c0_186 = arith.constant 0 : index
    %248 = vector.load %arg3[%c3_185, %c0_186] : memref<9x256xf32, #tpu.memory_space<vmem>>, vector<1x256xf32>
    %249 = vector.broadcast %248 : vector<1x256xf32> to vector<4x256xf32>
    %250 = arith.mulf %247, %249 : vector<4x256xf32>
    %c12_187 = arith.constant 12 : index
    %c0_188 = arith.constant 0 : index
    %251 = vector.load %arg11[%c12_187, %c0_188] : memref<36x256xf32, #tpu.memory_space<vmem>>, vector<4x256xf32>
    tpu.vector_store %arg11[%c12_187, %c0_188], %250 {strides = array<i32>} : memref<36x256xf32, #tpu.memory_space<vmem>>, vector<4x256xf32>,
    %c16_189 = arith.constant 16 : index
    %c0_190 = arith.constant 0 : index
    %252 = vector.load %arg11[%c16_189, %c0_190] : memref<36x256xf32, #tpu.memory_space<vmem>>, vector<4x256xf32>
    tpu.vector_store %arg11[%c16_189, %c0_190], %231 {strides = array<i32>} : memref<36x256xf32, #tpu.memory_space<vmem>>, vector<4x256xf32>,
    %c255_i32_191 = arith.constant 255 : i32
    %253 = tpu.dynamic_rotate %231 by %c255_i32_191 dim 1 : vector<4x256xf32>, i32 -> vector<4x256xf32>
    %c5_192 = arith.constant 5 : index
    %c0_193 = arith.constant 0 : index
    %254 = vector.load %arg3[%c5_192, %c0_193] : memref<9x256xf32, #tpu.memory_space<vmem>>, vector<1x256xf32>
    %255 = vector.broadcast %254 : vector<1x256xf32> to vector<4x256xf32>
    %256 = arith.mulf %253, %255 : vector<4x256xf32>
    %c20_194 = arith.constant 20 : index
    %c0_195 = arith.constant 0 : index
    %257 = vector.load %arg11[%c20_194, %c0_195] : memref<36x256xf32, #tpu.memory_space<vmem>>, vector<4x256xf32>
    tpu.vector_store %arg11[%c20_194, %c0_195], %256 {strides = array<i32>} : memref<36x256xf32, #tpu.memory_space<vmem>>, vector<4x256xf32>,
    %c241_i32_196 = arith.constant 241 : i32
    %258 = tpu.dynamic_rotate %231 by %c241_i32_196 dim 1 : vector<4x256xf32>, i32 -> vector<4x256xf32>
    %c6_197 = arith.constant 6 : index
    %c0_198 = arith.constant 0 : index
    %259 = vector.load %arg3[%c6_197, %c0_198] : memref<9x256xf32, #tpu.memory_space<vmem>>, vector<1x256xf32>
    %260 = vector.broadcast %259 : vector<1x256xf32> to vector<4x256xf32>
    %261 = arith.mulf %258, %260 : vector<4x256xf32>
    %c24_199 = arith.constant 24 : index
    %c0_200 = arith.constant 0 : index
    %262 = vector.load %arg11[%c24_199, %c0_200] : memref<36x256xf32, #tpu.memory_space<vmem>>, vector<4x256xf32>
    tpu.vector_store %arg11[%c24_199, %c0_200], %261 {strides = array<i32>} : memref<36x256xf32, #tpu.memory_space<vmem>>, vector<4x256xf32>,
    %c240_i32_201 = arith.constant 240 : i32
    %263 = tpu.dynamic_rotate %231 by %c240_i32_201 dim 1 : vector<4x256xf32>, i32 -> vector<4x256xf32>
    %c7_202 = arith.constant 7 : index
    %c0_203 = arith.constant 0 : index
    %264 = vector.load %arg3[%c7_202, %c0_203] : memref<9x256xf32, #tpu.memory_space<vmem>>, vector<1x256xf32>
    %265 = vector.broadcast %264 : vector<1x256xf32> to vector<4x256xf32>
    %266 = arith.mulf %263, %265 : vector<4x256xf32>
    %c28_204 = arith.constant 28 : index
    %c0_205 = arith.constant 0 : index
    %267 = vector.load %arg11[%c28_204, %c0_205] : memref<36x256xf32, #tpu.memory_space<vmem>>, vector<4x256xf32>
    tpu.vector_store %arg11[%c28_204, %c0_205], %266 {strides = array<i32>} : memref<36x256xf32, #tpu.memory_space<vmem>>, vector<4x256xf32>,
    %c239_i32_206 = arith.constant 239 : i32
    %268 = tpu.dynamic_rotate %231 by %c239_i32_206 dim 1 : vector<4x256xf32>, i32 -> vector<4x256xf32>
    %c8_207 = arith.constant 8 : index
    %c0_208 = arith.constant 0 : index
    %269 = vector.load %arg3[%c8_207, %c0_208] : memref<9x256xf32, #tpu.memory_space<vmem>>, vector<1x256xf32>
    %270 = vector.broadcast %269 : vector<1x256xf32> to vector<4x256xf32>
    %271 = arith.mulf %268, %270 : vector<4x256xf32>
    %c32_209 = arith.constant 32 : index
    %c0_210 = arith.constant 0 : index
    %272 = vector.load %arg11[%c32_209, %c0_210] : memref<36x256xf32, #tpu.memory_space<vmem>>, vector<4x256xf32>
    tpu.vector_store %arg11[%c32_209, %c0_210], %271 {strides = array<i32>} : memref<36x256xf32, #tpu.memory_space<vmem>>, vector<4x256xf32>,
    %c0_211 = arith.constant 0 : index
    %c0_212 = arith.constant 0 : index
    %273 = vector.load %arg11[%c0_211, %c0_212] : memref<36x256xf32, #tpu.memory_space<vmem>>, vector<36x256xf32>
    %cst_213 = arith.constant dense<0.000000e+00> : vector<4x256xf32>
    %274 = tpu.matmul %150, %273, %cst_213 {dimension_numbers = #tpu.dot_dimension_numbers<[1], [0], [0], [1], [0, 0, 1, 1], [], []>} : vector<4x36xf32>, vector<36x256xf32>, vector<4x256xf32> -> vector<4x256xf32>
    %275 = vector.broadcast %152 : vector<4x1xf32> to vector<4x256xf32>
    %276 = arith.addf %274, %275 : vector<4x256xf32>
    %cst_214 = arith.constant 0.000000e+00 : f32
    %277 = vector.broadcast %cst_214 : f32 to vector<4x256xf32>
    %278 = arith.cmpf ogt, %276, %277 : vector<4x256xf32>
    %cst_215 = arith.constant 2.000000e-01 : f32
    %279 = vector.broadcast %cst_215 : f32 to vector<4x256xf32>
    %280 = arith.mulf %279, %276 : vector<4x256xf32>
    %281 = arith.select %278, %276, %280 : vector<4x256xi1>, vector<4x256xf32>
    %282 = arith.addf %144, %281 : vector<4x256xf32>
    %cst_216 = arith.constant 0.000000e+00 : f32
    %283 = vector.broadcast %cst_216 : f32 to vector<4x256xf32>
    %284 = arith.subf %283, %282 : vector<4x256xf32>
    %285 = math.exp %284 : vector<4x256xf32>
    %cst_217 = arith.constant 1.000000e+00 : f32
    %286 = vector.broadcast %cst_217 : f32 to vector<4x256xf32>
    %287 = arith.addf %286, %285 : vector<4x256xf32>
    %cst_218 = arith.constant 1.000000e+00 : f32
    %288 = vector.broadcast %cst_218 : f32 to vector<4x256xf32>
    %289 = arith.divf %288, %287 : vector<4x256xf32>
    %cst_219 = arith.constant 2.000000e+00 : f32
    %290 = vector.broadcast %cst_219 : f32 to vector<4x256xf32>
    %291 = arith.mulf %289, %290 : vector<4x256xf32>
    %cst_220 = arith.constant 1.000000e+00 : f32
    %292 = vector.broadcast %cst_220 : f32 to vector<4x256xf32>
    %293 = arith.subf %291, %292 : vector<4x256xf32>
    %cst_221 = arith.constant 8.000000e-01 : f32
    %294 = vector.broadcast %cst_221 : f32 to vector<4x256xf32>
    %295 = arith.mulf %294, %293 : vector<4x256xf32>
    %296 = math.exp %295 : vector<4x256xf32>
    %297 = arith.mulf %5, %296 : vector<4x256xf32>
    %c1_222 = arith.constant 1 : index
    %c0_223 = arith.constant 0 : index
    %c0_224 = arith.constant 0 : index
    %298 = vector.load %arg4[%c1_222, %c0_223, %c0_224] : memref<3x4x36xf32, #tpu.memory_space<vmem>>, vector<1x4x36xf32>
    %299 = vector.shape_cast %298 : vector<1x4x36xf32> to vector<4x36xf32>
    %c1_225 = arith.constant 1 : index
    %c0_226 = arith.constant 0 : index
    %c0_227 = arith.constant 0 : index
    %300 = vector.load %arg5[%c1_225, %c0_226, %c0_227] : memref<3x4x1xf32, #tpu.memory_space<vmem>>, vector<1x4x1xf32>
    %301 = vector.shape_cast %300 : vector<1x4x1xf32> to vector<4x1xf32>
    %c1_228 = arith.constant 1 : index
    %c0_229 = arith.constant 0 : index
    %c0_230 = arith.constant 0 : index
    %302 = vector.load %arg6[%c1_228, %c0_229, %c0_230] : memref<3x4x36xf32, #tpu.memory_space<vmem>>, vector<1x4x36xf32>
    %303 = vector.shape_cast %302 : vector<1x4x36xf32> to vector<4x36xf32>
    %c1_231 = arith.constant 1 : index
    %c0_232 = arith.constant 0 : index
    %c0_233 = arith.constant 0 : index
    %304 = vector.load %arg7[%c1_231, %c0_232, %c0_233] : memref<3x4x1xf32, #tpu.memory_space<vmem>>, vector<1x4x1xf32>
    %305 = vector.shape_cast %304 : vector<1x4x1xf32> to vector<4x1xf32>
    %c1_234 = arith.constant 1 : index
    %c0_235 = arith.constant 0 : index
    %c0_236 = arith.constant 0 : index
    %306 = vector.load %arg8[%c1_234, %c0_235, %c0_236] : memref<3x2x1xf32, #tpu.memory_space<vmem>>, vector<1x2x1xf32>
    %307 = vector.shape_cast %306 : vector<1x2x1xf32> to vector<2x1xf32>
    %c1_237 = arith.constant 1 : index
    %c0_238 = arith.constant 0 : index
    %c0_239 = arith.constant 0 : index
    %308 = vector.load %arg9[%c1_237, %c0_238, %c0_239] : memref<3x2x1xf32, #tpu.memory_space<vmem>>, vector<1x2x1xf32>
    %309 = vector.shape_cast %308 : vector<1x2x1xf32> to vector<2x1xf32>
    %c17_i32_240 = arith.constant 17 : i32
    %310 = tpu.dynamic_rotate %144 by %c17_i32_240 dim 1 : vector<4x256xf32>, i32 -> vector<4x256xf32>
    %c0_241 = arith.constant 0 : index
    %c0_242 = arith.constant 0 : index
    %311 = vector.load %arg3[%c0_241, %c0_242] : memref<9x256xf32, #tpu.memory_space<vmem>>, vector<1x256xf32>
    %312 = vector.broadcast %311 : vector<1x256xf32> to vector<4x256xf32>
    %313 = arith.mulf %310, %312 : vector<4x256xf32>
    %c0_243 = arith.constant 0 : index
    %c0_244 = arith.constant 0 : index
    %314 = vector.load %arg11[%c0_243, %c0_244] : memref<36x256xf32, #tpu.memory_space<vmem>>, vector<4x256xf32>
    tpu.vector_store %arg11[%c0_243, %c0_244], %313 {strides = array<i32>} : memref<36x256xf32, #tpu.memory_space<vmem>>, vector<4x256xf32>,
    %c16_i32_245 = arith.constant 16 : i32
    %315 = tpu.dynamic_rotate %144 by %c16_i32_245 dim 1 : vector<4x256xf32>, i32 -> vector<4x256xf32>
    %c1_246 = arith.constant 1 : index
    %c0_247 = arith.constant 0 : index
    %316 = vector.load %arg3[%c1_246, %c0_247] : memref<9x256xf32, #tpu.memory_space<vmem>>, vector<1x256xf32>
    %317 = vector.broadcast %316 : vector<1x256xf32> to vector<4x256xf32>
    %318 = arith.mulf %315, %317 : vector<4x256xf32>
    %c4_248 = arith.constant 4 : index
    %c0_249 = arith.constant 0 : index
    %319 = vector.load %arg11[%c4_248, %c0_249] : memref<36x256xf32, #tpu.memory_space<vmem>>, vector<4x256xf32>
    tpu.vector_store %arg11[%c4_248, %c0_249], %318 {strides = array<i32>} : memref<36x256xf32, #tpu.memory_space<vmem>>, vector<4x256xf32>,
    %c15_i32_250 = arith.constant 15 : i32
    %320 = tpu.dynamic_rotate %144 by %c15_i32_250 dim 1 : vector<4x256xf32>, i32 -> vector<4x256xf32>
    %c2_251 = arith.constant 2 : index
    %c0_252 = arith.constant 0 : index
    %321 = vector.load %arg3[%c2_251, %c0_252] : memref<9x256xf32, #tpu.memory_space<vmem>>, vector<1x256xf32>
    %322 = vector.broadcast %321 : vector<1x256xf32> to vector<4x256xf32>
    %323 = arith.mulf %320, %322 : vector<4x256xf32>
    %c8_253 = arith.constant 8 : index
    %c0_254 = arith.constant 0 : index
    %324 = vector.load %arg11[%c8_253, %c0_254] : memref<36x256xf32, #tpu.memory_space<vmem>>, vector<4x256xf32>
    tpu.vector_store %arg11[%c8_253, %c0_254], %323 {strides = array<i32>} : memref<36x256xf32, #tpu.memory_space<vmem>>, vector<4x256xf32>,
    %c1_i32_255 = arith.constant 1 : i32
    %325 = tpu.dynamic_rotate %144 by %c1_i32_255 dim 1 : vector<4x256xf32>, i32 -> vector<4x256xf32>
    %c3_256 = arith.constant 3 : index
    %c0_257 = arith.constant 0 : index
    %326 = vector.load %arg3[%c3_256, %c0_257] : memref<9x256xf32, #tpu.memory_space<vmem>>, vector<1x256xf32>
    %327 = vector.broadcast %326 : vector<1x256xf32> to vector<4x256xf32>
    %328 = arith.mulf %325, %327 : vector<4x256xf32>
    %c12_258 = arith.constant 12 : index
    %c0_259 = arith.constant 0 : index
    %329 = vector.load %arg11[%c12_258, %c0_259] : memref<36x256xf32, #tpu.memory_space<vmem>>, vector<4x256xf32>
    tpu.vector_store %arg11[%c12_258, %c0_259], %328 {strides = array<i32>} : memref<36x256xf32, #tpu.memory_space<vmem>>, vector<4x256xf32>,
    %c16_260 = arith.constant 16 : index
    %c0_261 = arith.constant 0 : index
    %330 = vector.load %arg11[%c16_260, %c0_261] : memref<36x256xf32, #tpu.memory_space<vmem>>, vector<4x256xf32>
    tpu.vector_store %arg11[%c16_260, %c0_261], %144 {strides = array<i32>} : memref<36x256xf32, #tpu.memory_space<vmem>>, vector<4x256xf32>,
    %c255_i32_262 = arith.constant 255 : i32
    %331 = tpu.dynamic_rotate %144 by %c255_i32_262 dim 1 : vector<4x256xf32>, i32 -> vector<4x256xf32>
    %c5_263 = arith.constant 5 : index
    %c0_264 = arith.constant 0 : index
    %332 = vector.load %arg3[%c5_263, %c0_264] : memref<9x256xf32, #tpu.memory_space<vmem>>, vector<1x256xf32>
    %333 = vector.broadcast %332 : vector<1x256xf32> to vector<4x256xf32>
    %334 = arith.mulf %331, %333 : vector<4x256xf32>
    %c20_265 = arith.constant 20 : index
    %c0_266 = arith.constant 0 : index
    %335 = vector.load %arg11[%c20_265, %c0_266] : memref<36x256xf32, #tpu.memory_space<vmem>>, vector<4x256xf32>
    tpu.vector_store %arg11[%c20_265, %c0_266], %334 {strides = array<i32>} : memref<36x256xf32, #tpu.memory_space<vmem>>, vector<4x256xf32>,
    %c241_i32_267 = arith.constant 241 : i32
    %336 = tpu.dynamic_rotate %144 by %c241_i32_267 dim 1 : vector<4x256xf32>, i32 -> vector<4x256xf32>
    %c6_268 = arith.constant 6 : index
    %c0_269 = arith.constant 0 : index
    %337 = vector.load %arg3[%c6_268, %c0_269] : memref<9x256xf32, #tpu.memory_space<vmem>>, vector<1x256xf32>
    %338 = vector.broadcast %337 : vector<1x256xf32> to vector<4x256xf32>
    %339 = arith.mulf %336, %338 : vector<4x256xf32>
    %c24_270 = arith.constant 24 : index
    %c0_271 = arith.constant 0 : index
    %340 = vector.load %arg11[%c24_270, %c0_271] : memref<36x256xf32, #tpu.memory_space<vmem>>, vector<4x256xf32>
    tpu.vector_store %arg11[%c24_270, %c0_271], %339 {strides = array<i32>} : memref<36x256xf32, #tpu.memory_space<vmem>>, vector<4x256xf32>,
    %c240_i32_272 = arith.constant 240 : i32
    %341 = tpu.dynamic_rotate %144 by %c240_i32_272 dim 1 : vector<4x256xf32>, i32 -> vector<4x256xf32>
    %c7_273 = arith.constant 7 : index
    %c0_274 = arith.constant 0 : index
    %342 = vector.load %arg3[%c7_273, %c0_274] : memref<9x256xf32, #tpu.memory_space<vmem>>, vector<1x256xf32>
    %343 = vector.broadcast %342 : vector<1x256xf32> to vector<4x256xf32>
    %344 = arith.mulf %341, %343 : vector<4x256xf32>
    %c28_275 = arith.constant 28 : index
    %c0_276 = arith.constant 0 : index
    %345 = vector.load %arg11[%c28_275, %c0_276] : memref<36x256xf32, #tpu.memory_space<vmem>>, vector<4x256xf32>
    tpu.vector_store %arg11[%c28_275, %c0_276], %344 {strides = array<i32>} : memref<36x256xf32, #tpu.memory_space<vmem>>, vector<4x256xf32>,
    %c239_i32_277 = arith.constant 239 : i32
    %346 = tpu.dynamic_rotate %144 by %c239_i32_277 dim 1 : vector<4x256xf32>, i32 -> vector<4x256xf32>
    %c8_278 = arith.constant 8 : index
    %c0_279 = arith.constant 0 : index
    %347 = vector.load %arg3[%c8_278, %c0_279] : memref<9x256xf32, #tpu.memory_space<vmem>>, vector<1x256xf32>
    %348 = vector.broadcast %347 : vector<1x256xf32> to vector<4x256xf32>
    %349 = arith.mulf %346, %348 : vector<4x256xf32>
    %c32_280 = arith.constant 32 : index
    %c0_281 = arith.constant 0 : index
    %350 = vector.load %arg11[%c32_280, %c0_281] : memref<36x256xf32, #tpu.memory_space<vmem>>, vector<4x256xf32>
    tpu.vector_store %arg11[%c32_280, %c0_281], %349 {strides = array<i32>} : memref<36x256xf32, #tpu.memory_space<vmem>>, vector<4x256xf32>,
    %c0_282 = arith.constant 0 : index
    %c0_283 = arith.constant 0 : index
    %351 = vector.load %arg11[%c0_282, %c0_283] : memref<36x256xf32, #tpu.memory_space<vmem>>, vector<36x256xf32>
    %cst_284 = arith.constant dense<0.000000e+00> : vector<4x256xf32>
    %352 = tpu.matmul %299, %351, %cst_284 {dimension_numbers = #tpu.dot_dimension_numbers<[1], [0], [0], [1], [0, 0, 1, 1], [], []>} : vector<4x36xf32>, vector<36x256xf32>, vector<4x256xf32> -> vector<4x256xf32>
    %353 = vector.broadcast %301 : vector<4x1xf32> to vector<4x256xf32>
    %354 = arith.addf %352, %353 : vector<4x256xf32>
    %cst_285 = arith.constant 0.000000e+00 : f32
    %355 = vector.broadcast %cst_285 : f32 to vector<4x256xf32>
    %356 = arith.cmpf ogt, %354, %355 : vector<4x256xf32>
    %cst_286 = arith.constant 2.000000e-01 : f32
    %357 = vector.broadcast %cst_286 : f32 to vector<4x256xf32>
    %358 = arith.mulf %357, %354 : vector<4x256xf32>
    %359 = arith.select %356, %354, %358 : vector<4x256xi1>, vector<4x256xf32>
    %360 = vector.extract_strided_slice %359 {offsets = [0, 0], sizes = [2, 256], strides = [1, 1]} : vector<4x256xf32> to vector<2x256xf32>
    %cst_287 = arith.constant dense<0.000000e+00> : vector<2xf32>
    %361 = vector.multi_reduction <add>, %360, %cst_287 [1] : vector<2x256xf32> to vector<2xf32>
    %362 = vector.shape_cast %361 : vector<2xf32> to vector<2x1xf32>
    %cst_288 = arith.constant 2.560000e+02 : f32
    %363 = vector.broadcast %cst_288 : f32 to vector<2x1xf32>
    %364 = arith.divf %362, %363 : vector<2x1xf32>
    %365 = arith.mulf %360, %360 : vector<2x256xf32>
    %cst_289 = arith.constant dense<0.000000e+00> : vector<2xf32>
    %366 = vector.multi_reduction <add>, %365, %cst_289 [1] : vector<2x256xf32> to vector<2xf32>
    %367 = vector.shape_cast %366 : vector<2xf32> to vector<2x1xf32>
    %cst_290 = arith.constant 2.560000e+02 : f32
    %368 = vector.broadcast %cst_290 : f32 to vector<2x1xf32>
    %369 = arith.divf %367, %368 : vector<2x1xf32>
    %370 = arith.mulf %364, %364 : vector<2x1xf32>
    %371 = arith.subf %369, %370 : vector<2x1xf32>
    %372 = vector.broadcast %364 : vector<2x1xf32> to vector<2x256xf32>
    %373 = arith.subf %360, %372 : vector<2x256xf32>
    %cst_291 = arith.constant 9.99999974E-6 : f32
    %374 = vector.broadcast %cst_291 : f32 to vector<2x1xf32>
    %375 = arith.addf %371, %374 : vector<2x1xf32>
    %376 = math.rsqrt %375 : vector<2x1xf32>
    %377 = vector.broadcast %376 : vector<2x1xf32> to vector<2x256xf32>
    %378 = arith.mulf %373, %377 : vector<2x256xf32>
    %379 = vector.broadcast %307 : vector<2x1xf32> to vector<2x256xf32>
    %380 = arith.mulf %378, %379 : vector<2x256xf32>
    %381 = vector.broadcast %309 : vector<2x1xf32> to vector<2x256xf32>
    %382 = arith.addf %380, %381 : vector<2x256xf32>
    %383 = vector.extract_strided_slice %359 {offsets = [2, 0], sizes = [2, 256], strides = [1, 1]} : vector<4x256xf32> to vector<2x256xf32>
    %384 = tpu.concatenate %382, %383 in 0 : vector<2x256xf32>, vector<2x256xf32> -> vector<4x256xf32>
    %c17_i32_292 = arith.constant 17 : i32
    %385 = tpu.dynamic_rotate %384 by %c17_i32_292 dim 1 : vector<4x256xf32>, i32 -> vector<4x256xf32>
    %c0_293 = arith.constant 0 : index
    %c0_294 = arith.constant 0 : index
    %386 = vector.load %arg3[%c0_293, %c0_294] : memref<9x256xf32, #tpu.memory_space<vmem>>, vector<1x256xf32>
    %387 = vector.broadcast %386 : vector<1x256xf32> to vector<4x256xf32>
    %388 = arith.mulf %385, %387 : vector<4x256xf32>
    %c0_295 = arith.constant 0 : index
    %c0_296 = arith.constant 0 : index
    %389 = vector.load %arg11[%c0_295, %c0_296] : memref<36x256xf32, #tpu.memory_space<vmem>>, vector<4x256xf32>
    tpu.vector_store %arg11[%c0_295, %c0_296], %388 {strides = array<i32>} : memref<36x256xf32, #tpu.memory_space<vmem>>, vector<4x256xf32>,
    %c16_i32_297 = arith.constant 16 : i32
    %390 = tpu.dynamic_rotate %384 by %c16_i32_297 dim 1 : vector<4x256xf32>, i32 -> vector<4x256xf32>
    %c1_298 = arith.constant 1 : index
    %c0_299 = arith.constant 0 : index
    %391 = vector.load %arg3[%c1_298, %c0_299] : memref<9x256xf32, #tpu.memory_space<vmem>>, vector<1x256xf32>
    %392 = vector.broadcast %391 : vector<1x256xf32> to vector<4x256xf32>
    %393 = arith.mulf %390, %392 : vector<4x256xf32>
    %c4_300 = arith.constant 4 : index
    %c0_301 = arith.constant 0 : index
    %394 = vector.load %arg11[%c4_300, %c0_301] : memref<36x256xf32, #tpu.memory_space<vmem>>, vector<4x256xf32>
    tpu.vector_store %arg11[%c4_300, %c0_301], %393 {strides = array<i32>} : memref<36x256xf32, #tpu.memory_space<vmem>>, vector<4x256xf32>,
    %c15_i32_302 = arith.constant 15 : i32
    %395 = tpu.dynamic_rotate %384 by %c15_i32_302 dim 1 : vector<4x256xf32>, i32 -> vector<4x256xf32>
    %c2_303 = arith.constant 2 : index
    %c0_304 = arith.constant 0 : index
    %396 = vector.load %arg3[%c2_303, %c0_304] : memref<9x256xf32, #tpu.memory_space<vmem>>, vector<1x256xf32>
    %397 = vector.broadcast %396 : vector<1x256xf32> to vector<4x256xf32>
    %398 = arith.mulf %395, %397 : vector<4x256xf32>
    %c8_305 = arith.constant 8 : index
    %c0_306 = arith.constant 0 : index
    %399 = vector.load %arg11[%c8_305, %c0_306] : memref<36x256xf32, #tpu.memory_space<vmem>>, vector<4x256xf32>
    tpu.vector_store %arg11[%c8_305, %c0_306], %398 {strides = array<i32>} : memref<36x256xf32, #tpu.memory_space<vmem>>, vector<4x256xf32>,
    %c1_i32_307 = arith.constant 1 : i32
    %400 = tpu.dynamic_rotate %384 by %c1_i32_307 dim 1 : vector<4x256xf32>, i32 -> vector<4x256xf32>
    %c3_308 = arith.constant 3 : index
    %c0_309 = arith.constant 0 : index
    %401 = vector.load %arg3[%c3_308, %c0_309] : memref<9x256xf32, #tpu.memory_space<vmem>>, vector<1x256xf32>
    %402 = vector.broadcast %401 : vector<1x256xf32> to vector<4x256xf32>
    %403 = arith.mulf %400, %402 : vector<4x256xf32>
    %c12_310 = arith.constant 12 : index
    %c0_311 = arith.constant 0 : index
    %404 = vector.load %arg11[%c12_310, %c0_311] : memref<36x256xf32, #tpu.memory_space<vmem>>, vector<4x256xf32>
    tpu.vector_store %arg11[%c12_310, %c0_311], %403 {strides = array<i32>} : memref<36x256xf32, #tpu.memory_space<vmem>>, vector<4x256xf32>,
    %c16_312 = arith.constant 16 : index
    %c0_313 = arith.constant 0 : index
    %405 = vector.load %arg11[%c16_312, %c0_313] : memref<36x256xf32, #tpu.memory_space<vmem>>, vector<4x256xf32>
    tpu.vector_store %arg11[%c16_312, %c0_313], %384 {strides = array<i32>} : memref<36x256xf32, #tpu.memory_space<vmem>>, vector<4x256xf32>,
    %c255_i32_314 = arith.constant 255 : i32
    %406 = tpu.dynamic_rotate %384 by %c255_i32_314 dim 1 : vector<4x256xf32>, i32 -> vector<4x256xf32>
    %c5_315 = arith.constant 5 : index
    %c0_316 = arith.constant 0 : index
    %407 = vector.load %arg3[%c5_315, %c0_316] : memref<9x256xf32, #tpu.memory_space<vmem>>, vector<1x256xf32>
    %408 = vector.broadcast %407 : vector<1x256xf32> to vector<4x256xf32>
    %409 = arith.mulf %406, %408 : vector<4x256xf32>
    %c20_317 = arith.constant 20 : index
    %c0_318 = arith.constant 0 : index
    %410 = vector.load %arg11[%c20_317, %c0_318] : memref<36x256xf32, #tpu.memory_space<vmem>>, vector<4x256xf32>
    tpu.vector_store %arg11[%c20_317, %c0_318], %409 {strides = array<i32>} : memref<36x256xf32, #tpu.memory_space<vmem>>, vector<4x256xf32>,
    %c241_i32_319 = arith.constant 241 : i32
    %411 = tpu.dynamic_rotate %384 by %c241_i32_319 dim 1 : vector<4x256xf32>, i32 -> vector<4x256xf32>
    %c6_320 = arith.constant 6 : index
    %c0_321 = arith.constant 0 : index
    %412 = vector.load %arg3[%c6_320, %c0_321] : memref<9x256xf32, #tpu.memory_space<vmem>>, vector<1x256xf32>
    %413 = vector.broadcast %412 : vector<1x256xf32> to vector<4x256xf32>
    %414 = arith.mulf %411, %413 : vector<4x256xf32>
    %c24_322 = arith.constant 24 : index
    %c0_323 = arith.constant 0 : index
    %415 = vector.load %arg11[%c24_322, %c0_323] : memref<36x256xf32, #tpu.memory_space<vmem>>, vector<4x256xf32>
    tpu.vector_store %arg11[%c24_322, %c0_323], %414 {strides = array<i32>} : memref<36x256xf32, #tpu.memory_space<vmem>>, vector<4x256xf32>,
    %c240_i32_324 = arith.constant 240 : i32
    %416 = tpu.dynamic_rotate %384 by %c240_i32_324 dim 1 : vector<4x256xf32>, i32 -> vector<4x256xf32>
    %c7_325 = arith.constant 7 : index
    %c0_326 = arith.constant 0 : index
    %417 = vector.load %arg3[%c7_325, %c0_326] : memref<9x256xf32, #tpu.memory_space<vmem>>, vector<1x256xf32>
    %418 = vector.broadcast %417 : vector<1x256xf32> to vector<4x256xf32>
    %419 = arith.mulf %416, %418 : vector<4x256xf32>
    %c28_327 = arith.constant 28 : index
    %c0_328 = arith.constant 0 : index
    %420 = vector.load %arg11[%c28_327, %c0_328] : memref<36x256xf32, #tpu.memory_space<vmem>>, vector<4x256xf32>
    tpu.vector_store %arg11[%c28_327, %c0_328], %419 {strides = array<i32>} : memref<36x256xf32, #tpu.memory_space<vmem>>, vector<4x256xf32>,
    %c239_i32_329 = arith.constant 239 : i32
    %421 = tpu.dynamic_rotate %384 by %c239_i32_329 dim 1 : vector<4x256xf32>, i32 -> vector<4x256xf32>
    %c8_330 = arith.constant 8 : index
    %c0_331 = arith.constant 0 : index
    %422 = vector.load %arg3[%c8_330, %c0_331] : memref<9x256xf32, #tpu.memory_space<vmem>>, vector<1x256xf32>
    %423 = vector.broadcast %422 : vector<1x256xf32> to vector<4x256xf32>
    %424 = arith.mulf %421, %423 : vector<4x256xf32>
    %c32_332 = arith.constant 32 : index
    %c0_333 = arith.constant 0 : index
    %425 = vector.load %arg11[%c32_332, %c0_333] : memref<36x256xf32, #tpu.memory_space<vmem>>, vector<4x256xf32>
    tpu.vector_store %arg11[%c32_332, %c0_333], %424 {strides = array<i32>} : memref<36x256xf32, #tpu.memory_space<vmem>>, vector<4x256xf32>,
    %c0_334 = arith.constant 0 : index
    %c0_335 = arith.constant 0 : index
    %426 = vector.load %arg11[%c0_334, %c0_335] : memref<36x256xf32, #tpu.memory_space<vmem>>, vector<36x256xf32>
    %cst_336 = arith.constant dense<0.000000e+00> : vector<4x256xf32>
    %427 = tpu.matmul %303, %426, %cst_336 {dimension_numbers = #tpu.dot_dimension_numbers<[1], [0], [0], [1], [0, 0, 1, 1], [], []>} : vector<4x36xf32>, vector<36x256xf32>, vector<4x256xf32> -> vector<4x256xf32>
    %428 = vector.broadcast %305 : vector<4x1xf32> to vector<4x256xf32>
    %429 = arith.addf %427, %428 : vector<4x256xf32>
    %cst_337 = arith.constant 0.000000e+00 : f32
    %430 = vector.broadcast %cst_337 : f32 to vector<4x256xf32>
    %431 = arith.cmpf ogt, %429, %430 : vector<4x256xf32>
    %cst_338 = arith.constant 2.000000e-01 : f32
    %432 = vector.broadcast %cst_338 : f32 to vector<4x256xf32>
    %433 = arith.mulf %432, %429 : vector<4x256xf32>
    %434 = arith.select %431, %429, %433 : vector<4x256xi1>, vector<4x256xf32>
    %435 = arith.addf %144, %434 : vector<4x256xf32>
    %436 = arith.addf %297, %435 : vector<4x256xf32>
    %437 = tpu.concatenate %144, %436 in 0 : vector<4x256xf32>, vector<4x256xf32> -> vector<8x256xf32>
    %c0_339 = arith.constant 0 : index
    %c0_340 = arith.constant 0 : index
    %c0_341 = arith.constant 0 : index
    %438 = vector.load %arg10[%c0_339, %c0_340, %c0_341] : memref<1x8x256xf32, #tpu.memory_space<vmem>>, vector<1x8x256xf32>
    %439 = vector.shape_cast %438 : vector<1x8x256xf32> to vector<8x256xf32>
    %440 = vector.shape_cast %437 : vector<8x256xf32> to vector<1x8x256xf32>
    tpu.vector_store %arg10[%c0_339, %c0_340, %c0_341], %440 {strides = array<i32>} : memref<1x8x256xf32, #tpu.memory_space<vmem>>, vector<1x8x256xf32>,
    return
  }
  func.func @transform_0(%arg0: i32) -> (i32, i32, i32) {
    %c0_i32 = arith.constant 0 : i32
    %c0_i32_0 = arith.constant 0 : i32
    %c0_i32_1 = arith.constant 0 : i32
    return %arg0, %c0_i32, %c0_i32_0 : i32, i32, i32
  }
  func.func @transform_1(%arg0: i32) -> (i32, i32) {
    %c0_i32 = arith.constant 0 : i32
    %c0_i32_0 = arith.constant 0 : i32
    %c0_i32_1 = arith.constant 0 : i32
    return %c0_i32, %c0_i32_0 : i32, i32
  }
  func.func @transform_2(%arg0: i32) -> (i32, i32) {
    %c0_i32 = arith.constant 0 : i32
    %c0_i32_0 = arith.constant 0 : i32
    %c0_i32_1 = arith.constant 0 : i32
    return %c0_i32, %c0_i32_0 : i32, i32
  }
  func.func @transform_3(%arg0: i32) -> (i32, i32, i32) {
    %c0_i32 = arith.constant 0 : i32
    %c0_i32_0 = arith.constant 0 : i32
    %c0_i32_1 = arith.constant 0 : i32
    %c0_i32_2 = arith.constant 0 : i32
    return %c0_i32, %c0_i32_0, %c0_i32_1 : i32, i32, i32
  }
  func.func @transform_4(%arg0: i32) -> (i32, i32, i32) {
    %c0_i32 = arith.constant 0 : i32
    %c0_i32_0 = arith.constant 0 : i32
    %c0_i32_1 = arith.constant 0 : i32
    %c0_i32_2 = arith.constant 0 : i32
    return %c0_i32, %c0_i32_0, %c0_i32_1 : i32, i32, i32
  }
  func.func @transform_5(%arg0: i32) -> (i32, i32, i32) {
    %c0_i32 = arith.constant 0 : i32
    %c0_i32_0 = arith.constant 0 : i32
    %c0_i32_1 = arith.constant 0 : i32
    %c0_i32_2 = arith.constant 0 : i32
    return %c0_i32, %c0_i32_0, %c0_i32_1 : i32, i32, i32
  }
  func.func @transform_6(%arg0: i32) -> (i32, i32, i32) {
    %c0_i32 = arith.constant 0 : i32
    %c0_i32_0 = arith.constant 0 : i32
    %c0_i32_1 = arith.constant 0 : i32
    %c0_i32_2 = arith.constant 0 : i32
    return %c0_i32, %c0_i32_0, %c0_i32_1 : i32, i32, i32
  }
  func.func @transform_7(%arg0: i32) -> (i32, i32, i32) {
    %c0_i32 = arith.constant 0 : i32
    %c0_i32_0 = arith.constant 0 : i32
    %c0_i32_1 = arith.constant 0 : i32
    %c0_i32_2 = arith.constant 0 : i32
    return %c0_i32, %c0_i32_0, %c0_i32_1 : i32, i32, i32
  }
  func.func @transform_8(%arg0: i32) -> (i32, i32, i32) {
    %c0_i32 = arith.constant 0 : i32
    %c0_i32_0 = arith.constant 0 : i32
    %c0_i32_1 = arith.constant 0 : i32
    %c0_i32_2 = arith.constant 0 : i32
    return %c0_i32, %c0_i32_0, %c0_i32_1 : i32, i32, i32
  }
  func.func @transform_9(%arg0: i32) -> (i32, i32, i32) {
    %c0_i32 = arith.constant 0 : i32
    %c0_i32_0 = arith.constant 0 : i32
    %c0_i32_1 = arith.constant 0 : i32
    return %arg0, %c0_i32, %c0_i32_0 : i32, i32, i32
  }
}

</mosaic_0001>

<bundles_post_ra>
// kernel: inv_block.1
= control target key start
LH: loop header
LB: loop body
LE: loop exit
PB: predicated region body
PF: predicated region fallthrough
CT: control target
= control target key end

     0   :  { %s2711_s30 = smov 0   ;;  %s3443_s0 = inlined_call_operand.vmem [shape: f32[2,8,256], index: 0, kind: input, shape index: {}]   ;;  %s3444_s1 = inlined_call_operand.vmem [shape: f32[8,8], index: 1, kind: input, shape index: {}]   ;;  %s3445_s2 = inlined_call_operand.vmem [shape: f32[9,256], index: 2, kind: input, shape index: {}]   ;;  %s3446_s3 = inlined_call_operand.vmem [shape: f32[3,4,36], index: 3, kind: input, shape index: {}]   ;;  %s3447_s4 = inlined_call_operand.vmem [shape: f32[3,4,1], index: 4, kind: input, shape index: {}]   ;;  %s3448_s5 = inlined_call_operand.vmem [shape: f32[3,4,36], index: 5, kind: input, shape index: {}]   ;;  %s3449_s6 = inlined_call_operand.vmem [shape: f32[3,4,1], index: 6, kind: input, shape index: {}]   ;;  %s3450_s7 = inlined_call_operand.vmem [shape: f32[3,2,1], index: 7, kind: input, shape index: {}]   ;;  %s3451_s8 = inlined_call_operand.vmem [shape: f32[3,2,1], index: 8, kind: input, shape index: {}]   ;;  %s3452_s9 = inlined_call_operand.vmem [shape: f32[2,8,256], index: 9, kind: output, shape index: {}]  }
   0x1 LB: > { %s2469_s10 = sadd.s32 4294967295, %s2649_s30   ;;  %p2473_p0 = scmp.ge.s32.totalorder %s2649_s30, 1  ;;  %s2649_s30 = sphi %s2711_s30, %s19_s30  }
   0x2   : > { %p287_p1 = scmp.lt.s32.totalorder %s2649_s30, 3 }
   0x4   : > { %p288_p2 = pnand %p2473_p0, %p287_p1 }
   0x5   : > { %p323_p3 = scmp.lt.s32.totalorder (!%p288_p2), %s2469_s10, 1  ;;  %v2651_v0 = vmov (!%p288_p2), 0.0   ;;  %v335_v3 = vld [vmem:[%s3444_s1] sm:$0xff] (!%p288_p2)  ;;  %vm336_vm0 = vcmask (!%p288_p2), 64512   ;;  %s2652_s17 = smov (!%p288_p2), 1   ;;  %v2660_v9 = vmov (!%p288_p2), 0   ;;  %v427_v10 = vlaneseq (!%p288_p2) }
   0x6   : > { %291 = sbr.rel (%p288_p2) target bundleno = 2654 (0xa5e), region = 56  ;;  %404 = vmatprep.mubr.f32.mxu0 (!%p288_p2), %v2651_v0  ;;  %732 = vmatprep.mubr.f32.mxu1 (!%p288_p2), %v2651_v0  ;;  %s2653_s18 = smov (!%p288_p2), 16   ;;  %v412_v8 = vld [vmem:[%s3447_s4] sm:$0xf] (!%p288_p2)  ;;  %vm661_vm9 = vcmask (!%p288_p2), 1043456   ;;  %vm657_vm10 = vcmask (!%p288_p2), 293888  }
   0x7   : > { %s2654_s19 = smov (!%p288_p2), 17   ;;  %s2655_s20 = smov (!%p288_p2), 15   ;;  %2623 = vset.pattern.permute.xlu0 (!%p288_p2), %v2660_v9  ;;  %2624 = vset.pattern.permute.xlu1 (!%p288_p2), %v2660_v9  ;;  %v435_v11 = vshrl.u32 (!%p288_p2), %v427_v10, 7  ;;  %v2758_v12 = vand.u32 (!%p288_p2), 127, %v427_v10  ;;  %vm745_vm12 = vcmask (!%p288_p2), 1041408  }
   0x8   : > { %s2656_s21 = smov (!%p288_p2), 127   ;;  %s2657_s22 = smov (!%p288_p2), 112   ;;  %v2481_v15 = vld [vmem:[%s3445_s2 + $0x3] ss:$8 sm:$0x3] (!%p288_p2) }
   0x9   : > { %s2658_s23 = smov (!%p288_p2), 113   ;;  %s2659_s24 = smov (!%p288_p2), 111   ;;  %v2760_v13 = vsub.s32 (!%p288_p2), 0, %v435_v11  ;;  %v2762_v14 = vsub.s32 (!%p288_p2), 1, %v435_v11  ;;  %vm506_vm1 = vcmp.lt.s32.totalorder (!%p288_p2), %v2758_v12, 1  ;;  %vm429_vm2 = vcmp.lt.s32.totalorder (!%p288_p2), %v2758_v12, 17 }
   0xa   : > { %v432_v20 = vld [vmem:[%s3445_s2] ss:$8 sm:$0x3] (!%p288_p2)  ;;  %v2480_v29 = vld [vmem:[%s3445_s2 + $0x2] ss:$8 sm:$0x3] (!%p288_p2) }
   0xb   : > { %v515_v18 = vrot.slane (!%p288_p2), %v2481_v15, %v2760_v13  ;;  %v519_v19 = vrot.slane (!%p288_p2), %v2481_v15, %v2762_v14  ;;  %v437_v27 = vrot.slane (!%p288_p2), %v432_v20, %v2760_v13  ;;  %v441_v28 = vrot.slane (!%p288_p2), %v432_v20, %v2762_v14  ;;  %v2482_v36 = vld [vmem:[%s3445_s2 + $0x5] ss:$8 sm:$0x3] (!%p288_p2)  ;;  %v2479_v41 = vld [vmem:[%s3445_s2 + $0x1] ss:$8 sm:$0x3] (!%p288_p2) }
   0xc   : > { %vm482_vm3 = vcmp.lt.s32.totalorder (!%p288_p2), %v2758_v12, 15  ;;  %v491_v39 = vrot.slane (!%p288_p2), %v2480_v29, %v2760_v13  ;;  %v495_v40 = vrot.slane (!%p288_p2), %v2480_v29, %v2762_v14  ;;  %vm538_vm4 = vcmp.lt.s32.totalorder (!%p288_p2), %v2758_v12, 127  ;;  %v2484_v48 = vld [vmem:[%s3445_s2 + $0x7] ss:$8 sm:$0x3] (!%p288_p2) }
   0xd   : > { %s3454_s10 = smov (!%p323_p3, %s2469_s10), 1  ;;  %v547_v44 = vrot.slane %v2482_v36, %v2760_v13  ;;  %v551_v47 = vrot.slane %v2482_v36, %v2762_v14  ;;  %vm452_vm5 = vcmp.lt.s32.totalorder %v2758_v12, 16  ;;  %v461_v51 = vrot.slane %v2479_v41, %v2760_v13  ;;  %v2485_v20 = vld [vmem:[%s3445_s2 + $0x10] ss:$8 sm:$0x3] }
   0xe   : > { %s2555_s11 = sshll.u32 %s3454_s10, 4  ;;  %v465_v52 = vrot.slane %v2479_v41, %v2762_v14  ;;  %vm592_vm6 = vcmp.lt.s32.totalorder %v2758_v12, 112  ;;  %v601_v55 = vrot.slane %v2484_v48, %v2760_v13  ;;  %v605_v56 = vrot.slane %v2484_v48, %v2762_v14 }
   0xf   : > { %s327_s14 = scalar_lea.vmem %s3443_s0, %s2555_s11  ;;  %vm568_vm7 = vcmp.lt.s32.totalorder %v2758_v12, 113  ;;  %vm622_vm8 = vcmp.lt.s32.totalorder %v2758_v12, 111  ;;  %v631_v29 = vrot.slane %v2485_v20, %v2760_v13  ;;  %v2529_v12 = vld [vmem:[%s3448_s5 + $0x4] sm:$0xf] }
  0x10   : > { %v334_v1 = vld [vmem:[%s327_s14 + $0x8] sm:$0xff]  ;;  %v333_v2 = vld [vmem:[%s327_s14] sm:$0xff] }
  0x11   : > { %340 = vmatprep.subr.mxu0 %v334_v1 }
  0x12   : > { %341 = vmatpush1.msra.mxu0 %v333_v2  ;;  %v2483_v2 = vld [vmem:[%s3445_s2 + $0x6] ss:$8 sm:$0x3] }
  0x13   : > { %2478 = vmatmul.mubr.msk.f32.vlgmr.msra.gmra.mrb[0].mxu0 %vm336_vm0, %v335_v3 }
  0x14   : > { %1075 = vmatprep.mubr.f32.mxu0 %v2651_v0 }
  0xe6   : > { %v2733_v4 = vpop.f32.mrb[0].mxu0 }
  0xe7   : > { %v419_v5 = vrot.slane %v2733_v4, 4  ;;  %v2736_v6 = vpop.f32.mrb[1].mxu0 }
  0xe8   : > { %v420_v7 = vrot.slane %v2736_v6, 4 }
  0xe9   : > { %532 = vst [vmem:[#allocation2 + $0x20] sm:$0xf] %v419_v5  ;;  %502 = vrot.lane.b32.xlu1 %v419_v5, %s2652_s17  ;;  %448 = vrot.lane.b32.xlu0 %v419_v5, %s2653_s18 }
  0xea   : > { %533 = vst [vmem:[#allocation2 + $0x28] sm:$0xf] %v420_v7 }
  0xed   : > { %423 = vrot.lane.b32.xlu0 %v419_v5, %s2654_s19  ;;  %504 = vrot.lane.b32.xlu1 %v420_v7, %s2652_s17 }
  0xf1   : > { %478 = vrot.lane.b32.xlu0 %v419_v5, %s2655_s20  ;;  %425 = vrot.lane.b32.xlu1 %v420_v7, %s2654_s19 }
  0xf5   : > { %534 = vrot.lane.b32.xlu0 %v419_v5, %s2656_s21  ;;  %480 = vrot.lane.b32.xlu1 %v420_v7, %s2655_s20 }
  0xf9   : > { %536 = vrot.lane.b32.xlu1 %v420_v7, %s2656_s21  ;;  %450 = vrot.lane.b32.xlu0 %v420_v7, %s2653_s18 }
  0xfd   : > { %590 = vrot.lane.b32.xlu1 %v420_v7, %s2657_s22  ;;  %588 = vrot.lane.b32.xlu0 %v419_v5, %s2657_s22 }
 0x101   : > { %566 = vrot.lane.b32.xlu1 %v420_v7, %s2658_s23  ;;  %564 = vrot.lane.b32.xlu0 %v419_v5, %s2658_s23 }
 0x105   : > { %620 = vrot.lane.b32.xlu1 %v420_v7, %s2659_s24  ;;  %618 = vrot.lane.b32.xlu0 %v419_v5, %s2659_s24 }
 0x109   : > { %654 = vperm.xlu0 %2623, %v412_v8  }
 0x15b   : > { %v503_v16 = vpop.permute.xlu1 %502  ;;  %v449_v17 = vpop.permute.xlu0 %448 }
 0x15f   : > { %v424_v21 = vpop.permute.xlu0 %423  ;;  %v505_v22 = vpop.permute.xlu1 %504 }
 0x160   : > { %v507_v23 = vsel %vm506_vm1, %v503_v16, %v505_v22  ;;  %v508_v24 = vsel %vm506_vm1, %v505_v22, %v503_v16 }
 0x161   : > { %v522_v25 = vmul.f32 %v515_v18, %v508_v24  ;;  %v523_v26 = vmul.f32 %v519_v19, %v507_v23  ;;  %v577_v18 = vrot.slane %v2483_v2, %v2760_v13  ;;  %v581_v19 = vrot.slane %v2483_v2, %v2762_v14 }
 0x163   : > { %v526_v30 = vrot.slane %v522_v25, 4  ;;  %v527_v31 = vrot.slane %v523_v26, 4  ;;  %v479_v32 = vpop.permute.xlu0 %478  ;;  %v426_v33 = vpop.permute.xlu1 %425 }
 0x164   : > { %v430_v34 = vsel %vm429_vm2, %v424_v21, %v426_v33  ;;  %v431_v35 = vsel %vm429_vm2, %v426_v33, %v424_v21 }
 0x165   : > { %530 = vst [vmem:[#allocation2 + $0x10] sm:$0xf0] %v526_v30  ;;  %531 = vst [vmem:[#allocation2 + $0x18] sm:$0xf0] %v527_v31  ;;  %v444_v37 = vmul.f32 %v437_v27, %v431_v35  ;;  %v445_v38 = vmul.f32 %v441_v28, %v430_v34  ;;  %v635_v30 = vrot.slane %v2485_v20, %v2762_v14 }
 0x167   : > { %446 = vst [vmem:[#allocation2] sm:$0xf] %v444_v37  ;;  %447 = vst [vmem:[#allocation2 + $0x8] sm:$0xf] %v445_v38  ;;  %v535_v42 = vpop.permute.xlu0 %534  ;;  %v481_v43 = vpop.permute.xlu1 %480 }
 0x168   : > { %v483_v45 = vsel %vm482_vm3, %v479_v32, %v481_v43  ;;  %v484_v46 = vsel %vm482_vm3, %v481_v43, %v479_v32 }
 0x169   : > { %v498_v49 = vmul.f32 %v491_v39, %v484_v46  ;;  %v499_v50 = vmul.f32 %v495_v40, %v483_v45 }
 0x16b   : > { %500 = vst [vmem:[#allocation2 + $0x10] sm:$0xf] %v498_v49  ;;  %501 = vst [vmem:[#allocation2 + $0x18] sm:$0xf] %v499_v50  ;;  %v537_v53 = vpop.permute.xlu1 %536  ;;  %v451_v54 = vpop.permute.xlu0 %450  ;;  %v411_v50 = vld [vmem:[%s3446_s3] sm:$0xf] }
 0x16c   : > { %v539_v57 = vsel %vm538_vm4, %v535_v42, %v537_v53  ;;  %v540_v58 = vsel %vm538_vm4, %v537_v53, %v535_v42  ;;  %v453_v59 = vsel %vm452_vm5, %v449_v17, %v451_v54  ;;  %v454_v60 = vsel %vm452_vm5, %v451_v54, %v449_v17 }
 0x16d   : > { %v554_v61 = vmul.f32 %v547_v44, %v539_v57  ;;  %v555_v62 = vmul.f32 %v551_v47, %v540_v58  ;;  %v468_v63 = vmul.f32 %v461_v51, %v454_v60  ;;  %v469_v1 = vmul.f32 %v465_v52, %v453_v59 }
 0x16f   : > { %v558_v3 = vrot.slane %v554_v61, 4  ;;  %v559_v5 = vrot.slane %v555_v62, 4  ;;  %v472_v7 = vrot.slane %v468_v63, 4  ;;  %v473_v8 = vrot.slane %v469_v1, 4  ;;  %v591_v9 = vpop.permute.xlu1 %590  ;;  %v589_v10 = vpop.permute.xlu0 %588 }
 0x170   : > { %v593_v11 = vsel %vm592_vm6, %v589_v10, %v591_v9  ;;  %v594_v15 = vsel %vm592_vm6, %v591_v9, %v589_v10  ;;  %v416_v9 = vld [vmem:[%s3451_s8] sm:$0x3] }
 0x171   : > { %562 = vst [vmem:[#allocation2 + $0x20] sm:$0xf0] %v558_v3  ;;  %563 = vst [vmem:[#allocation2 + $0x28] sm:$0xf0] %v559_v5  ;;  %v608_v16 = vmul.f32 %v601_v55, %v593_v11  ;;  %v609_v17 = vmul.f32 %v605_v56, %v594_v15 }
 0x172   : > { %476 = vst [vmem:[#allocation2] sm:$0xf0] %v472_v7  ;;  %477 = vst [vmem:[#allocation2 + $0x8] sm:$0xf0] %v473_v8  ;;  %v645_v33 = vld [vmem:[#allocation2 + $0x18] sm:$0xff]  ;;  %v644_v38 = vld [vmem:[#allocation2 + $0x10] sm:$0xff] }
 0x173   : > { %v612_v21 = vrot.slane %v608_v16, 4  ;;  %v613_v22 = vrot.slane %v609_v17, 4  ;;  %v567_v23 = vpop.permute.xlu1 %566  ;;  %v565_v24 = vpop.permute.xlu0 %564  ;;  %v415_v8 = vld [vmem:[%s3450_s7] sm:$0x3] }
 0x174   : > { %v569_v25 = vsel %vm568_vm7, %v565_v24, %v567_v23  ;;  %v570_v26 = vsel %vm568_vm7, %v567_v23, %v565_v24 }
 0x175   : > { %616 = vst [vmem:[#allocation2 + $0x30] sm:$0xf0] %v612_v21  ;;  %617 = vst [vmem:[#allocation2 + $0x38] sm:$0xf0] %v613_v22  ;;  %v584_v27 = vmul.f32 %v577_v18, %v569_v25  ;;  %v585_v28 = vmul.f32 %v581_v19, %v570_v26 }
 0x177   : > { %586 = vst [vmem:[#allocation2 + $0x30] sm:$0xf] %v584_v27  ;;  %587 = vst [vmem:[#allocation2 + $0x38] sm:$0xf] %v585_v28  ;;  %v621_v31 = vpop.permute.xlu1 %620  ;;  %v619_v32 = vpop.permute.xlu0 %618 }
 0x178   : > { %v623_v34 = vsel %vm622_vm8, %v619_v32, %v621_v31  ;;  %v624_v35 = vsel %vm622_vm8, %v621_v31, %v619_v32  ;;  %v647_v43 = vld [vmem:[#allocation2 + $0x28] sm:$0xff]  ;;  %v646_v45 = vld [vmem:[#allocation2 + $0x20] sm:$0xff] }
 0x179   : > { %v643_v36 = vld [vmem:[#allocation2 + $0x8] sm:$0xff]  ;;  %v642_v37 = vld [vmem:[#allocation2] sm:$0xff]  ;;  %v638_v39 = vmul.f32 %v631_v29, %v623_v34  ;;  %v639_v40 = vmul.f32 %v635_v30, %v624_v35 }
 0x17a   : > { %v2557_v41 = vpack.c.bf16 %v645_v33, %v643_v36  ;;  %v2559_v42 = vpack.c.bf16 %v644_v38, %v642_v37  ;;  %v414_v33 = vld [vmem:[%s3449_s6] sm:$0xf] }
 0x17b   : > { %640 = vst [vmem:[#allocation2 + $0x40] sm:$0xf] %v638_v39  ;;  %641 = vst [vmem:[#allocation2 + $0x48] sm:$0xf] %v639_v40 }
 0x17c   : > { %2558 = vmatprep.subr.bf16.mxu1 %v2557_v41  ;;  %v2489_v34 = vld [vmem:[%s3445_s2 + $0x1] ss:$8 sm:$0x3]  ;;  %v2491_v39 = vld [vmem:[%s3445_s2 + $0x3] ss:$8 sm:$0x3] }
 0x17d   : > { %2560 = vmatpush1.bf16.msra.mxu1 %v2559_v42  ;;  %v818_v37 = vrot.slane %v2489_v34, %v2760_v13  ;;  %v822_v38 = vrot.slane %v2489_v34, %v2762_v14 }
 0x17e   : > { %v649_v44 = vld [vmem:[#allocation2 + $0x38] sm:$0xff]  ;;  %v648_v46 = vld [vmem:[#allocation2 + $0x30] sm:$0xff] }
 0x17f   : > { %v2561_v47 = vpack.c.bf16 %v649_v44, %v647_v43  ;;  %v2563_v48 = vpack.c.bf16 %v648_v46, %v646_v45  ;;  %v868_v46 = vrot.slane %v2491_v39, %v2760_v13 }
 0x181   : > { %2562 = vmatprep.subr.bf16.mxu1 %v2561_v47  ;;  %v872_v47 = vrot.slane %v2491_v39, %v2762_v14 }
 0x182   : > { %2564 = vmatpush1.bf16.msra.mxu1 %v2563_v48  ;;  %v651_v49 = vld [vmem:[#allocation2 + $0x48] sm:$0xf]  ;;  %v650_v51 = vld [vmem:[#allocation2 + $0x40] sm:$0xf] }
 0x183   : > { %2486 = vmatprep.subr.msk.mxu1 %vm661_vm9, %v651_v49  ;;  %v791_v48 = vld [vmem:[%s3445_s2] ss:$8 sm:$0x3] }
 0x186   : > { %2487 = vmatpush1.msk.msra.mxu1 %vm661_vm9, %v650_v51 }
 0x187   : > { %2488 = vmatmul.mubr.msk.f32.vlgmr.msra.gmra.mrb[0].mxu1 %vm657_vm10, %v411_v50 }
 0x188   : > { %1406 = vmatprep.mubr.f32.mxu1 %v2651_v0  ;;  %v655_v52 = vpop.permute.xlu0 %654 }
 0x25a   : > { %v734_v53 = vpop.f32.mrb[0].mxu1 }
 0x25b   : > { %v735_v54 = vadd.f32 %v734_v53, %v655_v52  ;;  %v736_v55 = vpop.f32.mrb[1].mxu1 }
 0x25c   : > { %v737_v56 = vadd.f32 %v736_v55, %v655_v52 }
 0x25d   : > { %vm739_vm11 = vcmp.gt.f32.partialorder %v735_v54, 0.0  ;;  %v741_v57 = vmul.f32 0.2, %v735_v54 }
 0x25e   : > { %vm740_vm13 = vcmp.gt.f32.partialorder %v737_v56, 0.0  ;;  %v742_v58 = vmul.f32 0.2, %v737_v56 }
 0x25f   : > { %v743_v59 = vsel %vm739_vm11, %v735_v54, %v741_v57  ;;  %v796_v57 = vrot.slane %v791_v48, %v2760_v13 }
 0x260   : > { %v744_v60 = vsel %vm740_vm13, %v737_v56, %v742_v58  ;;  %v746_v61 = vsel %vm745_vm12, %v743_v59, 0.0  ;;  %v753_v62 = vmul.f32 %v743_v59, %v743_v59  ;;  %v800_v58 = vrot.slane %v791_v48, %v2762_v14 }
 0x261   : > { %v747_v63 = vsel %vm745_vm12, %v744_v60, 0.0  ;;  %v754_v1 = vmul.f32 %v744_v60, %v744_v60 }
 0x262   : > { %v748_v2 = vadd.f32 %v747_v63, %v746_v61  ;;  %v755_v3 = vsel %vm745_vm12, %v753_v62, 0.0 }
 0x263   : > { %v756_v5 = vsel %vm745_vm12, %v754_v1, 0.0 }
 0x264   : > { %749 = vadd.xlane.f32.xlu1 %v748_v2  ;;  %v757_v7 = vadd.f32 %v756_v5, %v755_v3 }
 0x266   : > { %758 = vadd.xlane.f32.xlu0 %v757_v7 }
 0x275   : > { %771 = vperm.xlu1 %2624, %v415_v8  }
 0x27c   : > { %778 = vperm.xlu0 %2623, %v416_v9   ;;  %v2492_v9 = vld [vmem:[%s3445_s2 + $0x5] ss:$8 sm:$0x3] }
 0x2f1   : > { %v750_v10 = vpop.xlane.xlu1 %749 }
 0x2f2   : > { %v752_v11 = vmul.f32 0.00390625, %v750_v10 }
 0x2f3   : > { %v759_v15 = vpop.xlane.xlu0 %758 }
 0x2f4   : > { %v760_v16 = vmul.f32 0.00390625, %v759_v15  ;;  %v761_v17 = vmul.f32 %v752_v11, %v752_v11  ;;  %v763_v20 = vsub.f32 %v743_v59, %v752_v11  ;;  %v764_v21 = vsub.f32 %v744_v60, %v752_v11 }
 0x2f5   : > { %v772_v23 = vpop.permute.xlu1 %771 }
 0x2f6   : > { %v762_v18 = vsub.f32 %v760_v16, %v761_v17 }
 0x2f8   : > { %v765_v19 = vadd.f32 1e-05, %v762_v18  ;;  %v898_v18 = vrot.slane %v2492_v9, %v2760_v13 }
 0x2fa   : > { %2625 = vrsqrt.f32 %v765_v19  ;;  %v902_v19 = vrot.slane %v2492_v9, %v2762_v14 }
 0x2fb   : > { %v779_v28 = vpop.permute.xlu0 %778 }
 0x304   : > { %v2626_v22 = vpop.eup %2625 }
 0x305   : > { %v767_v24 = vmul.f32 %v2626_v22, %v763_v20  ;;  %v768_v25 = vmul.f32 %v2626_v22, %v764_v21  ;;  %v2494_v20 = vld [vmem:[%s3445_s2 + $0x7] ss:$8 sm:$0x3] }
 0x307   : > { %v774_v26 = vmul.f32 %v772_v23, %v767_v24  ;;  %v775_v27 = vmul.f32 %v772_v23, %v768_v25 }
 0x309   : > { %v781_v29 = vadd.f32 %v779_v28, %v774_v26  ;;  %v782_v30 = vadd.f32 %v779_v28, %v775_v27  ;;  %v948_v27 = vrot.slane %v2494_v20, %v2760_v13  ;;  %v952_v28 = vrot.slane %v2494_v20, %v2762_v14 }
 0x30b   : > { %v783_v31 = vsel %vm745_vm12, %v781_v29, %v743_v59  ;;  %v784_v32 = vsel %vm745_vm12, %v782_v30, %v744_v60  ;;  %v2490_v59 = vld [vmem:[%s3445_s2 + $0x2] ss:$8 sm:$0x3]  ;;  %v2493_v29 = vld [vmem:[%s3445_s2 + $0x6] ss:$8 sm:$0x3] }
 0x30c   : > { %885 = vst [vmem:[#allocation2 + $0x20] sm:$0xf] %v783_v31  ;;  %886 = vst [vmem:[#allocation2 + $0x28] sm:$0xf] %v784_v32  ;;  %857 = vrot.lane.b32.xlu0 %v783_v31, %s2652_s17  ;;  %807 = vrot.lane.b32.xlu1 %v783_v31, %s2653_s18  ;;  %v846_v7 = vrot.slane %v2490_v59, %v2760_v13  ;;  %v850_v8 = vrot.slane %v2490_v59, %v2762_v14 }
 0x30d   : > { %v930_v39 = vrot.slane %v2493_v29, %v2762_v14 }
 0x310   : > { %785 = vrot.lane.b32.xlu0 %v783_v31, %s2654_s19  ;;  %809 = vrot.lane.b32.xlu1 %v784_v32, %s2653_s18 }
 0x314   : > { %835 = vrot.lane.b32.xlu0 %v783_v31, %s2655_s20  ;;  %859 = vrot.lane.b32.xlu1 %v784_v32, %s2652_s17 }
 0x318   : > { %887 = vrot.lane.b32.xlu0 %v783_v31, %s2656_s21  ;;  %787 = vrot.lane.b32.xlu1 %v784_v32, %s2654_s19 }
 0x31c   : > { %937 = vrot.lane.b32.xlu0 %v783_v31, %s2657_s22  ;;  %837 = vrot.lane.b32.xlu1 %v784_v32, %s2655_s20 }
 0x320   : > { %915 = vrot.lane.b32.xlu0 %v783_v31, %s2658_s23  ;;  %889 = vrot.lane.b32.xlu1 %v784_v32, %s2656_s21 }
 0x324   : > { %965 = vrot.lane.b32.xlu0 %v783_v31, %s2659_s24  ;;  %939 = vrot.lane.b32.xlu1 %v784_v32, %s2657_s22 }
 0x328   : > { %999 = vperm.xlu0 %2623, %v414_v33   ;;  %917 = vrot.lane.b32.xlu1 %v784_v32, %s2658_s23 }
 0x32c   : > { %967 = vrot.lane.b32.xlu1 %v784_v32, %s2659_s24 }
 0x37e   : > { %v858_v35 = vpop.permute.xlu0 %857  ;;  %v808_v36 = vpop.permute.xlu1 %807 }
 0x382   : > { %v786_v40 = vpop.permute.xlu0 %785  ;;  %v810_v41 = vpop.permute.xlu1 %809 }
 0x383   : > { %v811_v42 = vsel %vm452_vm5, %v808_v36, %v810_v41  ;;  %v812_v43 = vsel %vm452_vm5, %v810_v41, %v808_v36  ;;  %v2495_v41 = vld [vmem:[%s3445_s2 + $0x10] ss:$8 sm:$0x3] }
 0x384   : > { %v825_v44 = vmul.f32 %v818_v37, %v812_v43  ;;  %v826_v45 = vmul.f32 %v822_v38, %v811_v42  ;;  %v926_v38 = vrot.slane %v2493_v29, %v2760_v13 }
 0x386   : > { %v829_v49 = vrot.slane %v825_v44, 4  ;;  %v830_v50 = vrot.slane %v826_v45, 4  ;;  %v836_v51 = vpop.permute.xlu0 %835  ;;  %v860_v52 = vpop.permute.xlu1 %859 }
 0x387   : > { %v861_v53 = vsel %vm506_vm1, %v858_v35, %v860_v52  ;;  %v862_v54 = vsel %vm506_vm1, %v860_v52, %v858_v35 }
 0x388   : > { %833 = vst [vmem:[#allocation2] sm:$0xf0] %v829_v49  ;;  %834 = vst [vmem:[#allocation2 + $0x8] sm:$0xf0] %v830_v50  ;;  %v875_v55 = vmul.f32 %v868_v46, %v862_v54  ;;  %v876_v56 = vmul.f32 %v872_v47, %v861_v53  ;;  %v976_v54 = vrot.slane %v2495_v41, %v2760_v13 }
 0x38a   : > { %v879_v60 = vrot.slane %v875_v55, 4  ;;  %v880_v61 = vrot.slane %v876_v56, 4  ;;  %v788_v62 = vpop.permute.xlu1 %787  ;;  %v888_v2 = vpop.permute.xlu0 %887  ;;  %v980_v55 = vrot.slane %v2495_v41, %v2762_v14 }
 0x38b   : > { %v789_v63 = vsel %vm429_vm2, %v786_v40, %v788_v62  ;;  %v790_v1 = vsel %vm429_vm2, %v788_v62, %v786_v40 }
 0x38c   : > { %883 = vst [vmem:[#allocation2 + $0x10] sm:$0xf0] %v879_v60  ;;  %884 = vst [vmem:[#allocation2 + $0x18] sm:$0xf0] %v880_v61  ;;  %v803_v3 = vmul.f32 %v796_v57, %v790_v1  ;;  %v804_v5 = vmul.f32 %v800_v58, %v789_v63 }
 0x38e   : > { %805 = vst [vmem:[#allocation2] sm:$0xf] %v803_v3  ;;  %806 = vst [vmem:[#allocation2 + $0x8] sm:$0xf] %v804_v5  ;;  %v838_v10 = vpop.permute.xlu1 %837  ;;  %v938_v21 = vpop.permute.xlu0 %937 }
 0x38f   : > { %v839_v11 = vsel %vm482_vm3, %v836_v51, %v838_v10  ;;  %v840_v15 = vsel %vm482_vm3, %v838_v10, %v836_v51 }
 0x390   : > { %v853_v16 = vmul.f32 %v846_v7, %v840_v15  ;;  %v854_v17 = vmul.f32 %v850_v8, %v839_v11  ;;  %v413_v8 = vld [vmem:[%s3448_s5] sm:$0xf] }
 0x392   : > { %855 = vst [vmem:[#allocation2 + $0x10] sm:$0xf] %v853_v16  ;;  %856 = vst [vmem:[#allocation2 + $0x18] sm:$0xf] %v854_v17  ;;  %v890_v22 = vpop.permute.xlu1 %889  ;;  %v916_v35 = vpop.permute.xlu0 %915 }
 0x393   : > { %v891_v23 = vsel %vm538_vm4, %v888_v2, %v890_v22  ;;  %v892_v24 = vsel %vm538_vm4, %v890_v22, %v888_v2 }
 0x394   : > { %v905_v25 = vmul.f32 %v898_v18, %v891_v23  ;;  %v906_v26 = vmul.f32 %v902_v19, %v892_v24 }
 0x395   : > { %v988_v40 = vld [vmem:[#allocation2 + $0x8] sm:$0xff]  ;;  %v987_v43 = vld [vmem:[#allocation2] sm:$0xff] }
 0x396   : > { %v909_v30 = vrot.slane %v905_v25, 4  ;;  %v910_v31 = vrot.slane %v906_v26, 4  ;;  %v940_v32 = vpop.permute.xlu1 %939  ;;  %v966_v56 = vpop.permute.xlu0 %965 }
 0x397   : > { %v941_v33 = vsel %vm592_vm6, %v938_v21, %v940_v32  ;;  %v942_v34 = vsel %vm592_vm6, %v940_v32, %v938_v21 }
 0x398   : > { %913 = vst [vmem:[#allocation2 + $0x20] sm:$0xf0] %v909_v30  ;;  %914 = vst [vmem:[#allocation2 + $0x28] sm:$0xf0] %v910_v31  ;;  %v955_v36 = vmul.f32 %v948_v27, %v941_v33  ;;  %v956_v37 = vmul.f32 %v952_v28, %v942_v34  ;;  %v2500_v30 = vld [vmem:[%s3447_s4 + $0x8] sm:$0xf] }
 0x399   : > { %v990_v42 = vld [vmem:[#allocation2 + $0x18] sm:$0xff]  ;;  %v989_v44 = vld [vmem:[#allocation2 + $0x10] sm:$0xff]  ;;  %v2505_v31 = vld [vmem:[%s3445_s2 + $0x1] ss:$8 sm:$0x3] }
 0x39a   : > { %v959_v45 = vrot.slane %v955_v36, 4  ;;  %v960_v46 = vrot.slane %v956_v37, 4  ;;  %v918_v47 = vpop.permute.xlu1 %917  ;;  %v2565_v48 = vpack.c.bf16 %v990_v42, %v988_v40  ;;  %v2567_v49 = vpack.c.bf16 %v989_v44, %v987_v43  ;;  %v1122_v44 = vld [vmem:[%s3445_s2] ss:$8 sm:$0x3] }
 0x39b   : > { %v919_v50 = vsel %vm568_vm7, %v916_v35, %v918_v47  ;;  %v920_v51 = vsel %vm568_vm7, %v918_v47, %v916_v35  ;;  %v1149_v32 = vrot.slane %v2505_v31, %v2760_v13  ;;  %v1153_v33 = vrot.slane %v2505_v31, %v2762_v14  ;;  %v2507_v35 = vld [vmem:[%s3445_s2 + $0x3] ss:$8 sm:$0x3] }
 0x39c   : > { %963 = vst [vmem:[#allocation2 + $0x30] sm:$0xf0] %v959_v45  ;;  %964 = vst [vmem:[#allocation2 + $0x38] sm:$0xf0] %v960_v46  ;;  %v933_v52 = vmul.f32 %v926_v38, %v919_v50  ;;  %v934_v53 = vmul.f32 %v930_v39, %v920_v51  ;;  %2566 = vmatprep.subr.bf16.mxu0 %v2565_v48  ;;  %v1199_v41 = vrot.slane %v2507_v35, %v2760_v13 }
 0x39d   : > { %2568 = vmatpush1.bf16.msra.mxu0 %v2567_v49  ;;  %v1203_v42 = vrot.slane %v2507_v35, %v2762_v14 }
 0x39e   : > { %935 = vst [vmem:[#allocation2 + $0x30] sm:$0xf] %v933_v52  ;;  %936 = vst [vmem:[#allocation2 + $0x38] sm:$0xf] %v934_v53  ;;  %v968_v57 = vpop.permute.xlu1 %967  ;;  %v1127_v52 = vrot.slane %v1122_v44, %v2760_v13  ;;  %v1131_v53 = vrot.slane %v1122_v44, %v2762_v14 }
 0x39f   : > { %v969_v58 = vsel %vm622_vm8, %v966_v56, %v968_v57  ;;  %v970_v59 = vsel %vm622_vm8, %v968_v57, %v966_v56  ;;  %v992_v62 = vld [vmem:[#allocation2 + $0x28] sm:$0xff]  ;;  %v991_v1 = vld [vmem:[#allocation2 + $0x20] sm:$0xff] }
 0x3a0   : > { %v983_v60 = vmul.f32 %v976_v54, %v969_v58  ;;  %v984_v61 = vmul.f32 %v980_v55, %v970_v59  ;;  %v2506_v55 = vld [vmem:[%s3445_s2 + $0x2] ss:$8 sm:$0x3] }
 0x3a2   : > { %985 = vst [vmem:[#allocation2 + $0x40] sm:$0xf] %v983_v60  ;;  %986 = vst [vmem:[#allocation2 + $0x48] sm:$0xf] %v984_v61 }
 0x3a5   : > { %v994_v63 = vld [vmem:[#allocation2 + $0x38] sm:$0xff]  ;;  %v993_v2 = vld [vmem:[#allocation2 + $0x30] sm:$0xff] }
 0x3a6   : > { %v2569_v3 = vpack.c.bf16 %v994_v63, %v992_v62  ;;  %v2571_v5 = vpack.c.bf16 %v993_v2, %v991_v1  ;;  %v1177_v63 = vrot.slane %v2506_v55, %v2760_v13  ;;  %v1181_v1 = vrot.slane %v2506_v55, %v2762_v14 }
 0x3a7   : > { %v1000_v10 = vpop.permute.xlu0 %999 }
 0x3a8   : > { %2570 = vmatprep.subr.bf16.mxu0 %v2569_v3  ;;  %v2508_v3 = vld [vmem:[%s3445_s2 + $0x5] ss:$8 sm:$0x3] }
 0x3a9   : > { %2572 = vmatpush1.bf16.msra.mxu0 %v2571_v5  ;;  %v996_v7 = vld [vmem:[#allocation2 + $0x48] sm:$0xf]  ;;  %v995_v9 = vld [vmem:[#allocation2 + $0x40] sm:$0xf] }
 0x3aa   : > { %2496 = vmatprep.subr.msk.mxu0 %vm661_vm9, %v996_v7 }
 0x3ad   : > { %2497 = vmatpush1.msk.msra.mxu0 %vm661_vm9, %v995_v9 }
 0x3ae   : > { %2498 = vmatmul.mubr.msk.f32.vlgmr.msra.gmra.mrb[2].mxu0 %vm657_vm10, %v413_v8 }
 0x3af   : > { %1747 = vmatprep.mubr.f32.mxu0 %v2651_v0 }
 0x481   : > { %v1077_v11 = vpop.f32.mrb[2].mxu0 }
 0x482   : > { %v1078_v15 = vadd.f32 %v1077_v11, %v1000_v10  ;;  %v1079_v16 = vpop.f32.mrb[3].mxu0  ;;  %v1229_v11 = vrot.slane %v2508_v3, %v2760_v13 }
 0x483   : > { %v1080_v17 = vadd.f32 %v1079_v16, %v1000_v10 }
 0x484   : > { %vm1082_vm14 = vcmp.gt.f32.partialorder %v1078_v15, 0.0  ;;  %v1084_v18 = vmul.f32 0.2, %v1078_v15 }
 0x485   : > { %vm1083_vm15 = vcmp.gt.f32.partialorder %v1080_v17, 0.0  ;;  %v1085_v19 = vmul.f32 0.2, %v1080_v17 }
 0x486   : > { %v1086_v20 = vsel %vm1082_vm14, %v1078_v15, %v1084_v18  ;;  %v1233_v15 = vrot.slane %v2508_v3, %v2762_v14 }
 0x487   : > { %v1090_v21 = vrot.slane %v1086_v20, 4  ;;  %v1087_v22 = vsel %vm1083_vm15, %v1080_v17, %v1085_v19  ;;  %v2510_v17 = vld [vmem:[%s3445_s2 + $0x7] ss:$8 sm:$0x3] }
 0x488   : > { %v1091_v23 = vrot.slane %v1087_v22, 4 }
 0x489   : > { %v1094_v24 = vadd.f32 %v1090_v21, %v2733_v4 }
 0x48a   : > { %v1095_v25 = vadd.f32 %v1091_v23, %v2736_v6  ;;  %v1279_v23 = vrot.slane %v2510_v17, %v2760_v13 }
 0x48b   : > { %v1098_v26 = vrot.slane %v1094_v24, 4  ;;  %v1283_v24 = vrot.slane %v2510_v17, %v2762_v14 }
 0x48c   : > { %v1099_v27 = vrot.slane %v1095_v25, 4 }
 0x48d   : > { %v2964_v28 = vadd.f32 %v1098_v26, %v2733_v4  ;;  %v2509_v26 = vld [vmem:[%s3445_s2 + $0x6] ss:$8 sm:$0x3] }
 0x48e   : > { %v2967_v29 = vadd.f32 %v1099_v27, %v2736_v6 }
 0x48f   : > { %1216 = vst [vmem:[#allocation2 + $0x20] sm:$0xf] %v2964_v28  ;;  %1138 = vrot.lane.b32.xlu1 %v2964_v28, %s2653_s18 }
 0x490   : > { %1217 = vst [vmem:[#allocation2 + $0x28] sm:$0xf] %v2967_v29  ;;  %1140 = vrot.lane.b32.xlu0 %v2967_v29, %s2653_s18 }
 0x493   : > { %1188 = vrot.lane.b32.xlu1 %v2964_v28, %s2652_s17 }
 0x494   : > { %1190 = vrot.lane.b32.xlu0 %v2967_v29, %s2652_s17 }
 0x497   : > { %1116 = vrot.lane.b32.xlu1 %v2964_v28, %s2654_s19 }
 0x498   : > { %1118 = vrot.lane.b32.xlu0 %v2967_v29, %s2654_s19 }
 0x49b   : > { %1166 = vrot.lane.b32.xlu1 %v2964_v28, %s2655_s20 }
 0x49c   : > { %1168 = vrot.lane.b32.xlu0 %v2967_v29, %s2655_s20 }
 0x49f   : > { %1218 = vrot.lane.b32.xlu1 %v2964_v28, %s2656_s21 }
 0x4a0   : > { %1220 = vrot.lane.b32.xlu0 %v2967_v29, %s2656_s21 }
 0x4a3   : > { %1268 = vrot.lane.b32.xlu1 %v2964_v28, %s2657_s22 }
 0x4a4   : > { %1270 = vrot.lane.b32.xlu0 %v2967_v29, %s2657_s22 }
 0x4a7   : > { %1246 = vrot.lane.b32.xlu1 %v2964_v28, %s2658_s23 }
 0x4a8   : > { %1248 = vrot.lane.b32.xlu0 %v2967_v29, %s2658_s23 }
 0x4ab   : > { %1296 = vrot.lane.b32.xlu1 %v2964_v28, %s2659_s24 }
 0x4ac   : > { %1298 = vrot.lane.b32.xlu0 %v2967_v29, %s2659_s24 }
 0x4af   : > { %1330 = vperm.xlu1 %2624, %v2500_v30  }
 0x501   : > { %v1139_v34 = vpop.permute.xlu1 %1138 }
 0x502   : > { %v1141_v36 = vpop.permute.xlu0 %1140 }
 0x503   : > { %v3016_v37 = vsel %vm452_vm5, %v1139_v34, %v1141_v36  ;;  %v3020_v38 = vsel %vm452_vm5, %v1141_v36, %v1139_v34  ;;  %v1257_v36 = vrot.slane %v2509_v26, %v2760_v13 }
 0x504   : > { %v1156_v39 = vmul.f32 %v1149_v32, %v3020_v38  ;;  %v1157_v40 = vmul.f32 %v1153_v33, %v3016_v37 }
 0x505   : > { %v1189_v43 = vpop.permute.xlu1 %1188 }
 0x506   : > { %v1160_v45 = vrot.slane %v1156_v39, 4  ;;  %v1161_v46 = vrot.slane %v1157_v40, 4  ;;  %v1191_v47 = vpop.permute.xlu0 %1190  ;;  %v1261_v39 = vrot.slane %v2509_v26, %v2762_v14 }
 0x507   : > { %v3031_v48 = vsel %vm506_vm1, %v1189_v43, %v1191_v47  ;;  %v3035_v49 = vsel %vm506_vm1, %v1191_v47, %v1189_v43  ;;  %v2511_v43 = vld [vmem:[%s3445_s2 + $0x10] ss:$8 sm:$0x3] }
 0x508   : > { %1164 = vst [vmem:[#allocation2] sm:$0xf0] %v1160_v45  ;;  %1165 = vst [vmem:[#allocation2 + $0x8] sm:$0xf0] %v1161_v46  ;;  %v1206_v50 = vmul.f32 %v1199_v41, %v3035_v49  ;;  %v1207_v51 = vmul.f32 %v1203_v42, %v3031_v48 }
 0x509   : > { %v1117_v54 = vpop.permute.xlu1 %1116 }
 0x50a   : > { %v1210_v56 = vrot.slane %v1206_v50, 4  ;;  %v1211_v57 = vrot.slane %v1207_v51, 4  ;;  %v1119_v58 = vpop.permute.xlu0 %1118 }
 0x50b   : > { %v3046_v59 = vsel %vm429_vm2, %v1117_v54, %v1119_v58  ;;  %v3050_v60 = vsel %vm429_vm2, %v1119_v58, %v1117_v54  ;;  %v1311_v58 = vrot.slane %v2511_v43, %v2762_v14 }
 0x50c   : > { %1214 = vst [vmem:[#allocation2 + $0x10] sm:$0xf0] %v1210_v56  ;;  %1215 = vst [vmem:[#allocation2 + $0x18] sm:$0xf0] %v1211_v57  ;;  %v1134_v61 = vmul.f32 %v1127_v52, %v3050_v60  ;;  %v1135_v62 = vmul.f32 %v1131_v53, %v3046_v59  ;;  %v1307_v57 = vrot.slane %v2511_v43, %v2760_v13 }
 0x50d   : > { %v1167_v2 = vpop.permute.xlu1 %1166 }
 0x50e   : > { %1136 = vst [vmem:[#allocation2] sm:$0xf] %v1134_v61  ;;  %1137 = vst [vmem:[#allocation2 + $0x8] sm:$0xf] %v1135_v62  ;;  %v1169_v5 = vpop.permute.xlu0 %1168 }
 0x50f   : > { %v3061_v7 = vsel %vm482_vm3, %v1167_v2, %v1169_v5  ;;  %v3065_v8 = vsel %vm482_vm3, %v1169_v5, %v1167_v2 }
 0x510   : > { %v1184_v9 = vmul.f32 %v1177_v63, %v3065_v8  ;;  %v1185_v10 = vmul.f32 %v1181_v1, %v3061_v7 }
 0x511   : > { %v1219_v16 = vpop.permute.xlu1 %1218 }
 0x512   : > { %1186 = vst [vmem:[#allocation2 + $0x10] sm:$0xf] %v1184_v9  ;;  %1187 = vst [vmem:[#allocation2 + $0x18] sm:$0xf] %v1185_v10  ;;  %v1221_v18 = vpop.permute.xlu0 %1220 }
 0x513   : > { %v3076_v19 = vsel %vm538_vm4, %v1219_v16, %v1221_v18  ;;  %v3080_v20 = vsel %vm538_vm4, %v1221_v18, %v1219_v16  ;;  %v2499_v18 = vld [vmem:[%s3446_s3 + $0x8] sm:$0xf] }
 0x514   : > { %v1236_v21 = vmul.f32 %v1229_v11, %v3076_v19  ;;  %v1237_v22 = vmul.f32 %v1233_v15, %v3080_v20 }
 0x515   : > { %v1269_v25 = vpop.permute.xlu1 %1268  ;;  %v1319_v47 = vld [vmem:[#allocation2 + $0x8] sm:$0xff]  ;;  %v1318_v50 = vld [vmem:[#allocation2] sm:$0xff] }
 0x516   : > { %v1240_v27 = vrot.slane %v1236_v21, 4  ;;  %v1241_v30 = vrot.slane %v1237_v22, 4  ;;  %v1271_v31 = vpop.permute.xlu0 %1270 }
 0x517   : > { %v3091_v32 = vsel %vm592_vm6, %v1269_v25, %v1271_v31  ;;  %v3095_v33 = vsel %vm592_vm6, %v1271_v31, %v1269_v25 }
 0x518   : > { %1244 = vst [vmem:[#allocation2 + $0x20] sm:$0xf0] %v1240_v27  ;;  %1245 = vst [vmem:[#allocation2 + $0x28] sm:$0xf0] %v1241_v30  ;;  %v1286_v34 = vmul.f32 %v1279_v23, %v3091_v32  ;;  %v1287_v35 = vmul.f32 %v1283_v24, %v3095_v33 }
 0x519   : > { %v1247_v40 = vpop.permute.xlu1 %1246  ;;  %v1321_v41 = vld [vmem:[#allocation2 + $0x18] sm:$0xff]  ;;  %v1320_v42 = vld [vmem:[#allocation2 + $0x10] sm:$0xff] }
 0x51a   : > { %v1290_v44 = vrot.slane %v1286_v34, 4  ;;  %v1291_v45 = vrot.slane %v1287_v35, 4  ;;  %v1249_v46 = vpop.permute.xlu0 %1248  ;;  %v2573_v53 = vpack.c.bf16 %v1321_v41, %v1319_v47  ;;  %v2575_v54 = vpack.c.bf16 %v1320_v42, %v1318_v50 }
 0x51b   : > { %v3106_v51 = vsel %vm568_vm7, %v1247_v40, %v1249_v46  ;;  %v3110_v52 = vsel %vm568_vm7, %v1249_v46, %v1247_v40  ;;  %v2503_v46 = vld [vmem:[%s3450_s7 + $0x4] sm:$0x3] }
 0x51c   : > { %1294 = vst [vmem:[#allocation2 + $0x30] sm:$0xf0] %v1290_v44  ;;  %1295 = vst [vmem:[#allocation2 + $0x38] sm:$0xf0] %v1291_v45  ;;  %v1264_v55 = vmul.f32 %v1257_v36, %v3106_v51  ;;  %v1265_v56 = vmul.f32 %v1261_v39, %v3110_v52  ;;  %2574 = vmatprep.subr.bf16.mxu1 %v2573_v53  ;;  %v2504_v45 = vld [vmem:[%s3451_s8 + $0x4] sm:$0x3] }
 0x51d   : > { %v1297_v61 = vpop.permute.xlu1 %1296  ;;  %2576 = vmatpush1.bf16.msra.mxu1 %v2575_v54 }
 0x51e   : > { %1266 = vst [vmem:[#allocation2 + $0x30] sm:$0xf] %v1264_v55  ;;  %1267 = vst [vmem:[#allocation2 + $0x38] sm:$0xf] %v1265_v56  ;;  %v1299_v62 = vpop.permute.xlu0 %1298 }
 0x51f   : > { %v3118_v63 = vsel %vm622_vm8, %v1297_v61, %v1299_v62  ;;  %v3122_v1 = vsel %vm622_vm8, %v1299_v62, %v1297_v61  ;;  %v1323_v5 = vld [vmem:[#allocation2 + $0x28] sm:$0xff]  ;;  %v1322_v10 = vld [vmem:[#allocation2 + $0x20] sm:$0xff] }
 0x520   : > { %v1314_v2 = vmul.f32 %v1307_v57, %v3118_v63  ;;  %v1315_v3 = vmul.f32 %v1311_v58, %v3122_v1 }
 0x522   : > { %1316 = vst [vmem:[#allocation2 + $0x40] sm:$0xf] %v1314_v2  ;;  %1317 = vst [vmem:[#allocation2 + $0x48] sm:$0xf] %v1315_v3 }
 0x525   : > { %v1325_v9 = vld [vmem:[#allocation2 + $0x38] sm:$0xff]  ;;  %v1324_v11 = vld [vmem:[#allocation2 + $0x30] sm:$0xff] }
 0x526   : > { %v2577_v15 = vpack.c.bf16 %v1325_v9, %v1323_v5  ;;  %v2579_v16 = vpack.c.bf16 %v1324_v11, %v1322_v10 }
 0x528   : > { %2578 = vmatprep.subr.bf16.mxu1 %v2577_v15 }
 0x529   : > { %2580 = vmatpush1.bf16.msra.mxu1 %v2579_v16  ;;  %v1327_v17 = vld [vmem:[#allocation2 + $0x48] sm:$0xf]  ;;  %v1326_v21 = vld [vmem:[#allocation2 + $0x40] sm:$0xf] }
 0x52a   : > { %2512 = vmatprep.subr.msk.mxu1 %vm661_vm9, %v1327_v17 }
 0x52d   : > { %2513 = vmatpush1.msk.msra.mxu1 %vm661_vm9, %v1326_v21  ;;  %v2528_v21 = vld [vmem:[%s3447_s4 + $0x4] sm:$0xf] }
 0x52e   : > { %2514 = vmatmul.mubr.msk.f32.vlgmr.msra.gmra.mrb[2].mxu1 %vm657_vm10, %v2499_v18  ;;  %v1331_v22 = vpop.permute.xlu1 %1330 }
 0x52f   : > { %2046 = vmatprep.mubr.f32.mxu1 %v2651_v0 }
 0x601   : > { %v1408_v23 = vpop.f32.mrb[2].mxu1 }
 0x602   : > { %v1409_v24 = vadd.f32 %v1408_v23, %v1331_v22  ;;  %v1410_v25 = vpop.f32.mrb[3].mxu1 }
 0x603   : > { %v1411_v26 = vadd.f32 %v1410_v25, %v1331_v22  ;;  %v2515_v22 = vld [vmem:[%s3445_s2 + $0x1] ss:$8 sm:$0x3]  ;;  %v2517_v25 = vld [vmem:[%s3445_s2 + $0x3] ss:$8 sm:$0x3] }
 0x604   : > { %vm1413_vm0 = vcmp.gt.f32.partialorder %v1409_v24, 0.0  ;;  %v1415_v27 = vmul.f32 0.2, %v1409_v24  ;;  %v1490_v23 = vrot.slane %v2515_v22, %v2760_v13 }
 0x605   : > { %vm1414_vm11 = vcmp.gt.f32.partialorder %v1411_v26, 0.0  ;;  %v1416_v30 = vmul.f32 0.2, %v1411_v26 }
 0x606   : > { %v1417_v31 = vsel %vm1413_vm0, %v1409_v24, %v1415_v27  ;;  %v1494_v24 = vrot.slane %v2515_v22, %v2762_v14 }
 0x607   : > { %v1418_v34 = vsel %vm1414_vm11, %v1411_v26, %v1416_v30  ;;  %v1419_v35 = vsel %vm745_vm12, %v1417_v31, 0.0  ;;  %v1425_v36 = vmul.f32 %v1417_v31, %v1417_v31 }
 0x608   : > { %v1420_v39 = vsel %vm745_vm12, %v1418_v34, 0.0  ;;  %v1426_v40 = vmul.f32 %v1418_v34, %v1418_v34 }
 0x609   : > { %v1421_v41 = vadd.f32 %v1420_v39, %v1419_v35  ;;  %v1427_v42 = vsel %vm745_vm12, %v1425_v36, 0.0  ;;  %v1540_v36 = vrot.slane %v2517_v25, %v2760_v13  ;;  %v1544_v39 = vrot.slane %v2517_v25, %v2762_v14 }
 0x60a   : > { %v1428_v43 = vsel %vm745_vm12, %v1426_v40, 0.0  ;;  %v1463_v40 = vld [vmem:[%s3445_s2] ss:$8 sm:$0x3] }
 0x60b   : > { %1422 = vadd.xlane.f32.xlu0 %v1421_v41  ;;  %v1429_v44 = vadd.f32 %v1428_v43, %v1427_v42 }
 0x60d   : > { %1430 = vadd.xlane.f32.xlu1 %v1429_v44 }
 0x61e   : > { %1450 = vperm.xlu1 %2624, %v2504_v45   ;;  %v2533_v45 = vld [vmem:[%s3445_s2 + $0x1] ss:$8 sm:$0x3] }
 0x621   : > { %1443 = vperm.xlu0 %2623, %v2503_v46  }
 0x698   : > { %v1423_v47 = vpop.xlane.xlu0 %1422 }
 0x699   : > { %v1424_v50 = vmul.f32 0.00390625, %v1423_v47 }
 0x69a   : > { %v1431_v53 = vpop.xlane.xlu1 %1430 }
 0x69b   : > { %v1432_v54 = vmul.f32 0.00390625, %v1431_v53  ;;  %v1433_v55 = vmul.f32 %v1424_v50, %v1424_v50  ;;  %v1435_v58 = vsub.f32 %v1417_v31, %v1424_v50  ;;  %v1436_v61 = vsub.f32 %v1418_v34, %v1424_v50 }
 0x69d   : > { %v1434_v56 = vsub.f32 %v1432_v54, %v1433_v55  ;;  %v1468_v54 = vrot.slane %v1463_v40, %v2760_v13  ;;  %v1472_v55 = vrot.slane %v1463_v40, %v2762_v14 }
 0x69e   : > { %v1451_v11 = vpop.permute.xlu1 %1450 }
 0x69f   : > { %v1437_v57 = vadd.f32 1e-05, %v1434_v56  ;;  %v2516_v56 = vld [vmem:[%s3445_s2 + $0x2] ss:$8 sm:$0x3] }
 0x6a0   : > { %v1444_v5 = vpop.permute.xlu0 %1443 }
 0x6a1   : > { %2627 = vrsqrt.f32 %v1437_v57  ;;  %v1825_v57 = vrot.slane %v2533_v45, %v2760_v13 }
 0x6a3   : > { %v1832_v22 = vmul.f32 %v1825_v57, %v3020_v38 }
 0x6ab   : > { %v2628_v62 = vpop.eup %2627 }
 0x6ac   : > { %v1439_v2 = vmul.f32 %v2628_v62, %v1435_v58  ;;  %v1440_v3 = vmul.f32 %v2628_v62, %v1436_v61  ;;  %v1829_v58 = vrot.slane %v2533_v45, %v2762_v14 }
 0x6ae   : > { %v1446_v9 = vmul.f32 %v1444_v5, %v1439_v2  ;;  %v1447_v10 = vmul.f32 %v1444_v5, %v1440_v3  ;;  %v2535_v5 = vld [vmem:[%s3445_s2 + $0x3] ss:$8 sm:$0x3] }
 0x6af   : > { %v1867_v25 = vrot.slane %v2535_v5, %v2762_v14 }
 0x6b0   : > { %v1453_v15 = vadd.f32 %v1451_v11, %v1446_v9  ;;  %v1454_v16 = vadd.f32 %v1451_v11, %v1447_v10  ;;  %v1804_v11 = vld [vmem:[%s3445_s2] ss:$8 sm:$0x3] }
 0x6b2   : > { %v1455_v17 = vsel %vm745_vm12, %v1453_v15, %v1417_v31  ;;  %v1456_v18 = vsel %vm745_vm12, %v1454_v16, %v1418_v34 }
 0x6b3   : > { %1557 = vst [vmem:[#allocation2 + $0x20] sm:$0xf] %v1455_v17  ;;  %1558 = vst [vmem:[#allocation2 + $0x28] sm:$0xf] %v1456_v18  ;;  %1481 = vrot.lane.b32.xlu1 %v1456_v18, %s2653_s18  ;;  %1479 = vrot.lane.b32.xlu0 %v1455_v17, %s2653_s18 }
 0x6b7   : > { %1531 = vrot.lane.b32.xlu1 %v1456_v18, %s2652_s17  ;;  %1529 = vrot.lane.b32.xlu0 %v1455_v17, %s2652_s17 }
 0x6bb   : > { %1459 = vrot.lane.b32.xlu1 %v1456_v18, %s2654_s19  ;;  %1457 = vrot.lane.b32.xlu0 %v1455_v17, %s2654_s19 }
 0x6bf   : > { %1509 = vrot.lane.b32.xlu1 %v1456_v18, %s2655_s20  ;;  %1507 = vrot.lane.b32.xlu0 %v1455_v17, %s2655_s20 }
 0x6c3   : > { %1561 = vrot.lane.b32.xlu1 %v1456_v18, %s2656_s21  ;;  %1559 = vrot.lane.b32.xlu0 %v1455_v17, %s2656_s21 }
 0x6c7   : > { %1611 = vrot.lane.b32.xlu1 %v1456_v18, %s2657_s22  ;;  %1609 = vrot.lane.b32.xlu0 %v1455_v17, %s2657_s22 }
 0x6cb   : > { %1589 = vrot.lane.b32.xlu1 %v1456_v18, %s2658_s23  ;;  %1587 = vrot.lane.b32.xlu0 %v1455_v17, %s2658_s23 }
 0x6cf   : > { %1639 = vrot.lane.b32.xlu1 %v1456_v18, %s2659_s24  ;;  %1637 = vrot.lane.b32.xlu0 %v1455_v17, %s2659_s24  ;;  %v1518_v17 = vrot.slane %v2516_v56, %v2760_v13  ;;  %v1522_v18 = vrot.slane %v2516_v56, %v2762_v14 }
 0x6d3   : > { %1970 = vperm.xlu0 %2623, %v2528_v21   ;;  %v2518_v21 = vld [vmem:[%s3445_s2 + $0x5] ss:$8 sm:$0x3] }
 0x6d4   : > { %v1574_v40 = vrot.slane %v2518_v21, %v2762_v14 }
 0x725   : > { %v1482_v26 = vpop.permute.xlu1 %1481  ;;  %v1480_v27 = vpop.permute.xlu0 %1479 }
 0x726   : > { %v1483_v30 = vsel %vm452_vm5, %v1480_v27, %v1482_v26  ;;  %v1484_v31 = vsel %vm452_vm5, %v1482_v26, %v1480_v27  ;;  %v2534_v26 = vld [vmem:[%s3445_s2 + $0x2] ss:$8 sm:$0x3] }
 0x727   : > { %v1497_v34 = vmul.f32 %v1490_v23, %v1484_v31  ;;  %v1498_v35 = vmul.f32 %v1494_v24, %v1483_v30  ;;  %v1833_v23 = vmul.f32 %v1829_v58, %v3016_v37  ;;  %v1863_v24 = vrot.slane %v2535_v5, %v2760_v13 }
 0x728   : > { %v1809_v31 = vrot.slane %v1804_v11, %v2760_v13 }
 0x729   : > { %v1501_v41 = vrot.slane %v1497_v34, 4  ;;  %v1502_v42 = vrot.slane %v1498_v35, 4  ;;  %v1532_v43 = vpop.permute.xlu1 %1531  ;;  %v1530_v44 = vpop.permute.xlu0 %1529  ;;  %v1813_v34 = vrot.slane %v1804_v11, %v2762_v14  ;;  %v1837_v45 = vrot.slane %v1833_v23, 4 }
 0x72a   : > { %v1533_v46 = vsel %vm506_vm1, %v1530_v44, %v1532_v43  ;;  %v1534_v47 = vsel %vm506_vm1, %v1532_v43, %v1530_v44  ;;  %v2520_v43 = vld [vmem:[%s3445_s2 + $0x7] ss:$8 sm:$0x3]  ;;  %v1836_v44 = vrot.slane %v1832_v22, 4 }
 0x72b   : > { %1505 = vst [vmem:[#allocation2] sm:$0xf0] %v1501_v41  ;;  %1506 = vst [vmem:[#allocation2 + $0x8] sm:$0xf0] %v1502_v42  ;;  %v1547_v50 = vmul.f32 %v1540_v36, %v1534_v47  ;;  %v1548_v53 = vmul.f32 %v1544_v39, %v1533_v46  ;;  %v1570_v39 = vrot.slane %v2518_v21, %v2760_v13 }
 0x72c   : > { %v1847_v41 = vrot.slane %v2534_v26, %v2760_v13  ;;  %v1851_v42 = vrot.slane %v2534_v26, %v2762_v14  ;;  %v1870_v46 = vmul.f32 %v1863_v24, %v3035_v49  ;;  %v1871_v47 = vmul.f32 %v1867_v25, %v3031_v48  ;;  %v2538_v24 = vld [vmem:[%s3445_s2 + $0x7] ss:$8 sm:$0x3] }
 0x72d   : > { %v1551_v61 = vrot.slane %v1547_v50, 4  ;;  %v1552_v62 = vrot.slane %v1548_v53, 4  ;;  %v1460_v2 = vpop.permute.xlu1 %1459  ;;  %v1458_v3 = vpop.permute.xlu0 %1457  ;;  %v2536_v50 = vld [vmem:[%s3445_s2 + $0x5] ss:$8 sm:$0x3]  ;;  %v1817_v56 = vmul.f32 %v1813_v34, %v3046_v59 }
 0x72e   : > { %v1461_v9 = vsel %vm429_vm2, %v1458_v3, %v1460_v2  ;;  %v1462_v10 = vsel %vm429_vm2, %v1460_v2, %v1458_v3  ;;  %v1887_v2 = vrot.slane %v2536_v50, %v2760_v13  ;;  %v1891_v3 = vrot.slane %v2536_v50, %v2762_v14  ;;  %v2519_v59 = vld [vmem:[%s3445_s2 + $0x6] ss:$8 sm:$0x3] }
 0x72f   : > { %1555 = vst [vmem:[#allocation2 + $0x10] sm:$0xf0] %v1551_v61  ;;  %1556 = vst [vmem:[#allocation2 + $0x18] sm:$0xf0] %v1552_v62  ;;  %v1475_v15 = vmul.f32 %v1468_v54, %v1462_v10  ;;  %v1476_v16 = vmul.f32 %v1472_v55, %v1461_v9  ;;  %v1816_v55 = vmul.f32 %v1809_v31, %v3050_v60  ;;  %v1874_v9 = vrot.slane %v1870_v46, 4 }
 0x730   : > { %v1620_v61 = vrot.slane %v2520_v43, %v2760_v13  ;;  %v1624_v62 = vrot.slane %v2520_v43, %v2762_v14  ;;  %v1875_v10 = vrot.slane %v1871_v47, 4  ;;  %v1855_v21 = vmul.f32 %v1851_v42, %v3061_v7 }
 0x731   : > { %1477 = vst [vmem:[#allocation2] sm:$0xf] %v1475_v15  ;;  %1478 = vst [vmem:[#allocation2 + $0x8] sm:$0xf] %v1476_v16  ;;  %v1510_v27 = vpop.permute.xlu1 %1509  ;;  %v1508_v30 = vpop.permute.xlu0 %1507  ;;  %v1894_v7 = vmul.f32 %v1887_v2, %v3076_v19  ;;  %v1925_v19 = vrot.slane %v2538_v24, %v2760_v13 }
 0x732   : > { %v1511_v38 = vsel %vm482_vm3, %v1508_v30, %v1510_v27  ;;  %v1512_v37 = vsel %vm482_vm3, %v1510_v27, %v1508_v30  ;;  %v1598_v27 = vrot.slane %v2519_v59, %v2760_v13  ;;  %v1895_v30 = vmul.f32 %v1891_v3, %v3080_v20 }
 0x733   : > { %v1525_v35 = vmul.f32 %v1518_v17, %v1512_v37  ;;  %v1526_v36 = vmul.f32 %v1522_v18, %v1511_v38  ;;  %v1854_v18 = vmul.f32 %v1847_v41, %v3065_v8  ;;  %v1602_v8 = vrot.slane %v2519_v59, %v2762_v14  ;;  %v2521_v38 = vld [vmem:[%s3445_s2 + $0x10] ss:$8 sm:$0x3] }
 0x734   : > { %v1929_v20 = vrot.slane %v2538_v24, %v2762_v14  ;;  %v1648_v47 = vrot.slane %v2521_v38, %v2760_v13  ;;  %v1652_v50 = vrot.slane %v2521_v38, %v2762_v14  ;;  %v1932_v2 = vmul.f32 %v1925_v19, %v3091_v32  ;;  %v2539_v59 = vld [vmem:[%s3445_s2 + $0x10] ss:$8 sm:$0x3] }
 0x735   : > { %1527 = vst [vmem:[#allocation2 + $0x10] sm:$0xf] %v1525_v35  ;;  %1528 = vst [vmem:[#allocation2 + $0x18] sm:$0xf] %v1526_v36  ;;  %v1562_v53 = vpop.permute.xlu1 %1561  ;;  %v1560_v54 = vpop.permute.xlu0 %1559 }
 0x736   : > { %v1563_v57 = vsel %vm538_vm4, %v1560_v54, %v1562_v53  ;;  %v1564_v49 = vsel %vm538_vm4, %v1562_v53, %v1560_v54  ;;  %v1898_v53 = vrot.slane %v1894_v7, 4  ;;  %v1899_v54 = vrot.slane %v1895_v30, 4 }
 0x737   : > { %v1577_v58 = vmul.f32 %v1570_v39, %v1563_v57  ;;  %v1578_v48 = vmul.f32 %v1574_v40, %v1564_v49  ;;  %v1933_v3 = vmul.f32 %v1929_v20, %v3095_v33 }
 0x738   : > { %v1660_v60 = vld [vmem:[#allocation2 + $0x8] sm:$0xff]  ;;  %v1659_v5 = vld [vmem:[#allocation2] sm:$0xff] }
 0x739   : > { %v1581_v11 = vrot.slane %v1577_v58, 4  ;;  %v1582_v15 = vrot.slane %v1578_v48, 4  ;;  %v1612_v16 = vpop.permute.xlu1 %1611  ;;  %v1610_v17 = vpop.permute.xlu0 %1609  ;;  %1819 = vst [vmem:[#allocation2 + $0x8] sm:$0xf] %v1817_v56  ;;  %1841 = vst [vmem:[#allocation2 + $0x8] sm:$0xf0] %v1837_v45 }
 0x73a   : > { %1818 = vst [vmem:[#allocation2] sm:$0xf] %v1816_v55  ;;  %1840 = vst [vmem:[#allocation2] sm:$0xf0] %v1836_v44  ;;  %v1613_v22 = vsel %vm592_vm6, %v1610_v17, %v1612_v16  ;;  %v1614_v23 = vsel %vm592_vm6, %v1612_v16, %v1610_v17  ;;  %v1947_v16 = vrot.slane %v2539_v59, %v2760_v13 }
 0x73b   : > { %1585 = vst [vmem:[#allocation2 + $0x20] sm:$0xf0] %v1581_v11  ;;  %1586 = vst [vmem:[#allocation2 + $0x28] sm:$0xf0] %v1582_v15  ;;  %v1627_v25 = vmul.f32 %v1620_v61, %v1613_v22  ;;  %v1628_v26 = vmul.f32 %v1624_v62, %v1614_v23  ;;  %v1951_v17 = vrot.slane %v2539_v59, %v2762_v14 }
 0x73c   : > { %v1662_v31 = vld [vmem:[#allocation2 + $0x18] sm:$0xff]  ;;  %v1661_v34 = vld [vmem:[#allocation2 + $0x10] sm:$0xff]  ;;  %v2537_v44 = vld [vmem:[%s3445_s2 + $0x6] ss:$8 sm:$0x3] }
 0x73d   : > { %v1631_v37 = vrot.slane %v1627_v25, 4  ;;  %v1632_v35 = vrot.slane %v1628_v26, 4  ;;  %v1590_v36 = vpop.permute.xlu1 %1589  ;;  %v1588_v39 = vpop.permute.xlu0 %1587  ;;  %v2581_v40 = vpack.c.bf16 %v1662_v31, %v1660_v60  ;;  %1857 = vst [vmem:[#allocation2 + $0x18] sm:$0xf] %v1855_v21  ;;  %1879 = vst [vmem:[#allocation2 + $0x18] sm:$0xf0] %v1875_v10  ;;  %v2583_v41 = vpack.c.bf16 %v1661_v34, %v1659_v5 }
 0x73e   : > { %1856 = vst [vmem:[#allocation2 + $0x10] sm:$0xf] %v1854_v18  ;;  %1878 = vst [vmem:[#allocation2 + $0x10] sm:$0xf0] %v1874_v9  ;;  %v1591_v42 = vsel %vm568_vm7, %v1588_v39, %v1590_v36  ;;  %v1592_v43 = vsel %vm568_vm7, %v1590_v36, %v1588_v39  ;;  %v1909_v57 = vrot.slane %v2537_v44, %v2760_v13  ;;  %v1936_v18 = vrot.slane %v1932_v2, 4 }
 0x73f   : > { %1635 = vst [vmem:[#allocation2 + $0x30] sm:$0xf0] %v1631_v37  ;;  %1636 = vst [vmem:[#allocation2 + $0x38] sm:$0xf0] %v1632_v35  ;;  %v1605_v45 = vmul.f32 %v1598_v27, %v1591_v42  ;;  %v1606_v46 = vmul.f32 %v1602_v8, %v1592_v43  ;;  %2582 = vmatprep.subr.bf16.mxu0 %v2581_v40  ;;  %v1913_v49 = vrot.slane %v2537_v44, %v2762_v14  ;;  %v2501_v39 = vld [vmem:[%s3448_s5 + $0x8] sm:$0xf] }
 0x740   : > { %2584 = vmatpush1.bf16.msra.mxu0 %v2583_v41  ;;  %v1959_v9 = vld [vmem:[#allocation2 + $0x8] sm:$0xff]  ;;  %v1937_v21 = vrot.slane %v1933_v3, 4  ;;  %v1916_v22 = vmul.f32 %v1909_v57, %v3106_v51  ;;  %v1954_v8 = vmul.f32 %v1947_v16, %v3118_v63  ;;  %v1955_v7 = vmul.f32 %v1951_v17, %v3122_v1  ;;  %v2527_v1 = vld [vmem:[%s3446_s3 + $0x4] sm:$0xf] }
 0x741   : > { %1607 = vst [vmem:[#allocation2 + $0x30] sm:$0xf] %v1605_v45  ;;  %1608 = vst [vmem:[#allocation2 + $0x38] sm:$0xf] %v1606_v46  ;;  %v1640_v55 = vpop.permute.xlu1 %1639  ;;  %v1638_v56 = vpop.permute.xlu0 %1637  ;;  %v1958_v11 = vld [vmem:[#allocation2] sm:$0xff]  ;;  %v1917_v23 = vmul.f32 %v1913_v49, %v3110_v52 }
 0x742   : > { %v1641_v58 = vsel %vm622_vm8, %v1638_v56, %v1640_v55  ;;  %v1642_v48 = vsel %vm622_vm8, %v1640_v55, %v1638_v56  ;;  %v1664_v61 = vld [vmem:[#allocation2 + $0x28] sm:$0xff]  ;;  %v1663_v62 = vld [vmem:[#allocation2 + $0x20] sm:$0xff] }
 0x743   : > { %v1655_v60 = vmul.f32 %v1648_v47, %v1641_v58  ;;  %v1656_v5 = vmul.f32 %v1652_v50, %v1642_v48  ;;  %1881 = vst [vmem:[#allocation2 + $0x28] sm:$0xf] %v2967_v29  ;;  %1903 = vst [vmem:[#allocation2 + $0x28] sm:$0xf0] %v1899_v54  ;;  %v2532_v49 = vld [vmem:[%s3451_s8 + $0x2] sm:$0x3] }
 0x744   : > { %1880 = vst [vmem:[#allocation2 + $0x20] sm:$0xf] %v2964_v28  ;;  %1902 = vst [vmem:[#allocation2 + $0x20] sm:$0xf0] %v1898_v53  ;;  %v1961_v10 = vld [vmem:[#allocation2 + $0x18] sm:$0xff] }
 0x745   : > { %v1960_v15 = vld [vmem:[#allocation2 + $0x10] sm:$0xff]  ;;  %1657 = vst [vmem:[#allocation2 + $0x40] sm:$0xf] %v1655_v60  ;;  %1658 = vst [vmem:[#allocation2 + $0x48] sm:$0xf] %v1656_v5  ;;  %v2589_v32 = vpack.c.bf16 %v1961_v10, %v1959_v9 }
 0x746   : > { %v2591_v33 = vpack.c.bf16 %v1960_v15, %v1958_v11  ;;  %v2531_v58 = vld [vmem:[%s3450_s7 + $0x2] sm:$0x3] }
 0x747   : > { %2590 = vmatprep.subr.bf16.mxu1 %v2589_v32 }
 0x748   : > { %2592 = vmatpush1.bf16.msra.mxu1 %v2591_v33  ;;  %v1666_v24 = vld [vmem:[#allocation2 + $0x38] sm:$0xff]  ;;  %v1665_v25 = vld [vmem:[#allocation2 + $0x30] sm:$0xff] }
 0x749   : > { %v2585_v26 = vpack.c.bf16 %v1666_v24, %v1664_v61  ;;  %1919 = vst [vmem:[#allocation2 + $0x38] sm:$0xf] %v1917_v23  ;;  %1941 = vst [vmem:[#allocation2 + $0x38] sm:$0xf0] %v1937_v21  ;;  %v2587_v27 = vpack.c.bf16 %v1665_v25, %v1663_v62  ;;  %v2530_v24 = vld [vmem:[%s3449_s6 + $0x4] sm:$0xf] }
 0x74a   : > { %1918 = vst [vmem:[#allocation2 + $0x30] sm:$0xf] %v1916_v22  ;;  %1940 = vst [vmem:[#allocation2 + $0x30] sm:$0xf0] %v1936_v18  ;;  %v1963_v52 = vld [vmem:[#allocation2 + $0x28] sm:$0xff] }
 0x74b   : > { %2586 = vmatprep.subr.bf16.mxu0 %v2585_v26  ;;  %v1962_v34 = vld [vmem:[#allocation2 + $0x20] sm:$0xff]  ;;  %v2502_v25 = vld [vmem:[%s3449_s6 + $0x8] sm:$0xf] }
 0x74c   : > { %2588 = vmatpush1.bf16.msra.mxu0 %v2587_v27  ;;  %v1668_v30 = vld [vmem:[#allocation2 + $0x48] sm:$0xf]  ;;  %v1667_v51 = vld [vmem:[#allocation2 + $0x40] sm:$0xf] }
 0x74d   : > { %2522 = vmatprep.subr.msk.mxu0 %vm661_vm9, %v1668_v30  ;;  %1957 = vst [vmem:[#allocation2 + $0x48] sm:$0xf] %v1955_v7  ;;  %1956 = vst [vmem:[#allocation2 + $0x40] sm:$0xf] %v1954_v8 }
 0x74e   : > { %v2543_v8 = vld [vmem:[%s3445_s2 + $0x1] ss:$8 sm:$0x3] }
 0x74f   : > { %v2130_v7 = vrot.slane %v2543_v8, %v2760_v13  ;;  %v2134_v30 = vrot.slane %v2543_v8, %v2762_v14 }
 0x750   : > { %2523 = vmatpush1.msk.msra.mxu0 %vm661_vm9, %v1667_v51  ;;  %v1965_v31 = vld [vmem:[#allocation2 + $0x38] sm:$0xff]  ;;  %v2545_v51 = vld [vmem:[%s3445_s2 + $0x3] ss:$8 sm:$0x3] }
 0x751   : > { %v1964_v38 = vld [vmem:[#allocation2 + $0x30] sm:$0xff]  ;;  %v2593_v37 = vpack.c.bf16 %v1965_v31, %v1963_v52  ;;  %2524 = vmatmul.mubr.msk.f32.vlgmr.msra.gmra.mrb[4].mxu0 %vm657_vm10, %v2501_v39 }
 0x752   : > { %v2595_v35 = vpack.c.bf16 %v1964_v38, %v1962_v34  ;;  %2387 = vmatprep.mubr.f32.mxu0 %v2651_v0  ;;  %v1971_v40 = vpop.permute.xlu0 %1970 }
 0x753   : > { %2594 = vmatprep.subr.bf16.mxu1 %v2593_v37 }
 0x754   : > { %2596 = vmatpush1.bf16.msra.mxu1 %v2595_v35  ;;  %v1967_v63 = vld [vmem:[#allocation2 + $0x48] sm:$0xf]  ;;  %v1966_v36 = vld [vmem:[#allocation2 + $0x40] sm:$0xf] }
 0x755   : > { %2540 = vmatprep.subr.msk.mxu1 %vm661_vm9, %v1967_v63  ;;  %v2180_v63 = vrot.slane %v2545_v51, %v2760_v13 }
 0x758   : > { %2541 = vmatpush1.msk.msra.mxu1 %vm661_vm9, %v1966_v36  ;;  %v2103_v36 = vld [vmem:[%s3445_s2] ss:$8 sm:$0x3] }
 0x759   : > { %2542 = vmatmul.mubr.msk.f32.vlgmr.msra.gmra.mrb[4].mxu1 %vm657_vm10, %v2527_v1  ;;  %v2184_v1 = vrot.slane %v2545_v51, %v2762_v14 }
 0x824   : > { %v3341_v26 = vpop.f32.mrb[4].mxu0 }
 0x825   : > { %v3343_v27 = vpop.f32.mrb[5].mxu0 }
 0x82c   : > { %v2048_v41 = vpop.f32.mrb[4].mxu1 }
 0x82d   : > { %v2049_v19 = vadd.f32 %v2048_v41, %v1971_v40  ;;  %v2050_v20 = vpop.f32.mrb[5].mxu1 }
 0x82e   : > { %v2051_v42 = vadd.f32 %v2050_v20, %v1971_v40 }
 0x82f   : > { %vm2053_vm13 = vcmp.gt.f32.partialorder %v2049_v19, 0.0  ;;  %v2055_v43 = vmul.f32 0.2, %v2049_v19 }
 0x830   : > { %vm2054_vm14 = vcmp.gt.f32.partialorder %v2051_v42, 0.0  ;;  %v2056_v44 = vmul.f32 0.2, %v2051_v42 }
 0x831   : > { %v2057_v45 = vsel %vm2053_vm13, %v2049_v19, %v2055_v43 }
 0x832   : > { %v2058_v46 = vsel %vm2054_vm14, %v2051_v42, %v2056_v44  ;;  %v2059_v47 = vsel %vm745_vm12, %v2057_v45, 0.0  ;;  %v2065_v50 = vmul.f32 %v2057_v45, %v2057_v45 }
 0x833   : > { %v2060_v53 = vsel %vm745_vm12, %v2058_v46, 0.0  ;;  %v2066_v54 = vmul.f32 %v2058_v46, %v2058_v46 }
 0x834   : > { %v2061_v55 = vadd.f32 %v2060_v53, %v2059_v47  ;;  %v2067_v0 = vsel %vm745_vm12, %v2065_v50, 0.0  ;;  %v2544_v47 = vld [vmem:[%s3445_s2 + $0x2] ss:$8 sm:$0x3] }
 0x835   : > { %v2068_v56 = vsel %vm745_vm12, %v2066_v54, 0.0 }
 0x836   : > { %2062 = vadd.xlane.f32.xlu1 %v2061_v55  ;;  %v2069_v57 = vadd.f32 %v2068_v56, %v2067_v0 }
 0x838   : > { %2070 = vadd.xlane.f32.xlu0 %v2069_v57 }
 0x847   : > { %2090 = vperm.xlu1 %2624, %v2532_v49  }
 0x84e   : > { %2083 = vperm.xlu0 %2623, %v2531_v58   ;;  %v2158_v58 = vrot.slane %v2544_v47, %v2760_v13 }
 0x8c3   : > { %v2063_v48 = vpop.xlane.xlu1 %2062 }
 0x8c4   : > { %v2064_v61 = vmul.f32 0.00390625, %v2063_v48  ;;  %v2162_v48 = vrot.slane %v2544_v47, %v2762_v14 }
 0x8c5   : > { %v2071_v62 = vpop.xlane.xlu0 %2070 }
 0x8c6   : > { %v2072_v2 = vmul.f32 0.00390625, %v2071_v62  ;;  %v2073_v3 = vmul.f32 %v2064_v61, %v2064_v61  ;;  %v2075_v5 = vsub.f32 %v2057_v45, %v2064_v61  ;;  %v2076_v9 = vsub.f32 %v2058_v46, %v2064_v61  ;;  %v2546_v61 = vld [vmem:[%s3445_s2 + $0x5] ss:$8 sm:$0x3] }
 0x8c7   : > { %v2091_v17 = vpop.permute.xlu1 %2090 }
 0x8c8   : > { %v2074_v59 = vsub.f32 %v2072_v2, %v2073_v3 }
 0x8ca   : > { %v2077_v60 = vadd.f32 1e-05, %v2074_v59 }
 0x8cc   : > { %2629 = vrsqrt.f32 %v2077_v60 }
 0x8cd   : > { %v2084_v32 = vpop.permute.xlu0 %2083 }
 0x8d6   : > { %v2630_v10 = vpop.eup %2629 }
 0x8d7   : > { %v2079_v11 = vmul.f32 %v2630_v10, %v2075_v5  ;;  %v2080_v15 = vmul.f32 %v2630_v10, %v2076_v9  ;;  %v2210_v9 = vrot.slane %v2546_v61, %v2760_v13  ;;  %v2214_v10 = vrot.slane %v2546_v61, %v2762_v14 }
 0x8d9   : > { %v2086_v33 = vmul.f32 %v2084_v32, %v2079_v11  ;;  %v2087_v16 = vmul.f32 %v2084_v32, %v2080_v15  ;;  %v2548_v11 = vld [vmem:[%s3445_s2 + $0x7] ss:$8 sm:$0x3] }
 0x8db   : > { %v2093_v18 = vadd.f32 %v2091_v17, %v2086_v33  ;;  %v2094_v21 = vadd.f32 %v2091_v17, %v2087_v16 }
 0x8dd   : > { %v2095_v22 = vsel %vm745_vm12, %v2093_v18, %v2057_v45  ;;  %v2096_v23 = vsel %vm745_vm12, %v2094_v21, %v2058_v46  ;;  %v2108_v45 = vrot.slane %v2103_v36, %v2760_v13  ;;  %v2112_v46 = vrot.slane %v2103_v36, %v2762_v14 }
 0x8de   : > { %2197 = vst [vmem:[#allocation2 + $0x20] sm:$0xf] %v2095_v22  ;;  %2198 = vst [vmem:[#allocation2 + $0x28] sm:$0xf] %v2096_v23  ;;  %2121 = vrot.lane.b32.xlu0 %v2096_v23, %s2653_s18  ;;  %2119 = vrot.lane.b32.xlu1 %v2095_v22, %s2653_s18  ;;  %v2260_v21 = vrot.slane %v2548_v11, %v2760_v13 }
 0x8e2   : > { %2171 = vrot.lane.b32.xlu0 %v2096_v23, %s2652_s17  ;;  %2169 = vrot.lane.b32.xlu1 %v2095_v22, %s2652_s17 }
 0x8e6   : > { %2099 = vrot.lane.b32.xlu0 %v2096_v23, %s2654_s19  ;;  %2097 = vrot.lane.b32.xlu1 %v2095_v22, %s2654_s19 }
 0x8ea   : > { %2149 = vrot.lane.b32.xlu0 %v2096_v23, %s2655_s20  ;;  %2147 = vrot.lane.b32.xlu1 %v2095_v22, %s2655_s20 }
 0x8ee   : > { %2201 = vrot.lane.b32.xlu0 %v2096_v23, %s2656_s21  ;;  %2199 = vrot.lane.b32.xlu1 %v2095_v22, %s2656_s21 }
 0x8f2   : > { %2251 = vrot.lane.b32.xlu0 %v2096_v23, %s2657_s22  ;;  %2249 = vrot.lane.b32.xlu1 %v2095_v22, %s2657_s22 }
 0x8f6   : > { %2229 = vrot.lane.b32.xlu0 %v2096_v23, %s2658_s23  ;;  %2227 = vrot.lane.b32.xlu1 %v2095_v22, %s2658_s23  ;;  %s332_s23 = scalar_lea.vmem %s3452_s9, %s2555_s11 }
 0x8fa   : > { %2279 = vrot.lane.b32.xlu0 %v2096_v23, %s2659_s24  ;;  %2277 = vrot.lane.b32.xlu1 %v2095_v22, %s2659_s24  ;;  %v2264_v22 = vrot.slane %v2548_v11, %v2762_v14  ;;  %v2547_v23 = vld [vmem:[%s3445_s2 + $0x6] ss:$8 sm:$0x3] }
 0x8fe   : > { %2311 = vperm.xlu0 %2623, %v2530_v24   ;;  %1671 = vperm.xlu1 %2624, %v2502_v25  }
 0x950   : > { %v2122_v52 = vpop.permute.xlu0 %2121  ;;  %v2120_v31 = vpop.permute.xlu1 %2119 }
 0x951   : > { %v2123_v34 = vsel %vm452_vm5, %v2120_v31, %v2122_v52  ;;  %v2124_v38 = vsel %vm452_vm5, %v2122_v52, %v2120_v31 }
 0x952   : > { %v2137_v37 = vmul.f32 %v2130_v7, %v2124_v38  ;;  %v2138_v35 = vmul.f32 %v2134_v30, %v2123_v34  ;;  %v2238_v34 = vrot.slane %v2547_v23, %v2760_v13  ;;  %v2242_v38 = vrot.slane %v2547_v23, %v2762_v14 }
 0x954   : > { %v2141_v39 = vrot.slane %v2137_v37, 4  ;;  %v2142_v40 = vrot.slane %v2138_v35, 4  ;;  %v2172_v41 = vpop.permute.xlu0 %2171  ;;  %v2170_v19 = vpop.permute.xlu1 %2169  ;;  %v2549_v35 = vld [vmem:[%s3445_s2 + $0x10] ss:$8 sm:$0x3] }
 0x955   : > { %v2173_v20 = vsel %vm506_vm1, %v2170_v19, %v2172_v41  ;;  %v2174_v42 = vsel %vm506_vm1, %v2172_v41, %v2170_v19  ;;  %v2288_v47 = vrot.slane %v2549_v35, %v2760_v13 }
 0x956   : > { %2145 = vst [vmem:[#allocation2] sm:$0xf0] %v2141_v39  ;;  %2146 = vst [vmem:[#allocation2 + $0x8] sm:$0xf0] %v2142_v40  ;;  %v2187_v43 = vmul.f32 %v2180_v63, %v2174_v42  ;;  %v2188_v44 = vmul.f32 %v2184_v1, %v2173_v20 }
 0x958   : > { %v2191_v50 = vrot.slane %v2187_v43, 4  ;;  %v2192_v53 = vrot.slane %v2188_v44, 4  ;;  %v2100_v54 = vpop.permute.xlu0 %2099  ;;  %v2098_v55 = vpop.permute.xlu1 %2097 }
 0x959   : > { %v2101_v0 = vsel %vm429_vm2, %v2098_v55, %v2100_v54  ;;  %v2102_v56 = vsel %vm429_vm2, %v2100_v54, %v2098_v55 }
 0x95a   : > { %2195 = vst [vmem:[#allocation2 + $0x10] sm:$0xf0] %v2191_v50  ;;  %2196 = vst [vmem:[#allocation2 + $0x18] sm:$0xf0] %v2192_v53  ;;  %v2115_v57 = vmul.f32 %v2108_v45, %v2102_v56  ;;  %v2116_v49 = vmul.f32 %v2112_v46, %v2101_v0  ;;  %v2292_v50 = vrot.slane %v2549_v35, %v2762_v14 }
 0x95c   : > { %2117 = vst [vmem:[#allocation2] sm:$0xf] %v2115_v57  ;;  %2118 = vst [vmem:[#allocation2 + $0x8] sm:$0xf] %v2116_v49  ;;  %v2150_v62 = vpop.permute.xlu0 %2149  ;;  %v2148_v2 = vpop.permute.xlu1 %2147 }
 0x95d   : > { %v2151_v3 = vsel %vm482_vm3, %v2148_v2, %v2150_v62  ;;  %v2152_v59 = vsel %vm482_vm3, %v2150_v62, %v2148_v2 }
 0x95e   : > { %v2165_v60 = vmul.f32 %v2158_v58, %v2152_v59  ;;  %v2166_v5 = vmul.f32 %v2162_v48, %v2151_v3 }
 0x960   : > { %2167 = vst [vmem:[#allocation2 + $0x10] sm:$0xf] %v2165_v60  ;;  %2168 = vst [vmem:[#allocation2 + $0x18] sm:$0xf] %v2166_v5  ;;  %v2202_v15 = vpop.permute.xlu0 %2201  ;;  %v2200_v32 = vpop.permute.xlu1 %2199 }
 0x961   : > { %v2203_v33 = vsel %vm538_vm4, %v2200_v32, %v2202_v15  ;;  %v2204_v16 = vsel %vm538_vm4, %v2202_v15, %v2200_v32 }
 0x962   : > { %v2217_v17 = vmul.f32 %v2210_v9, %v2203_v33  ;;  %v2218_v18 = vmul.f32 %v2214_v10, %v2204_v16 }
 0x963   : > { %v2300_v37 = vld [vmem:[#allocation2 + $0x8] sm:$0xff]  ;;  %v2299_v1 = vld [vmem:[#allocation2] sm:$0xff] }
 0x964   : > { %v2221_v24 = vrot.slane %v2217_v17, 4  ;;  %v2222_v25 = vrot.slane %v2218_v18, 4  ;;  %v2252_v8 = vpop.permute.xlu0 %2251  ;;  %v2250_v7 = vpop.permute.xlu1 %2249 }
 0x965   : > { %v2253_v30 = vsel %vm592_vm6, %v2250_v7, %v2252_v8  ;;  %v2254_v51 = vsel %vm592_vm6, %v2252_v8, %v2250_v7 }
 0x966   : > { %2225 = vst [vmem:[#allocation2 + $0x20] sm:$0xf0] %v2221_v24  ;;  %2226 = vst [vmem:[#allocation2 + $0x28] sm:$0xf0] %v2222_v25  ;;  %v2267_v52 = vmul.f32 %v2260_v21, %v2253_v30  ;;  %v2268_v31 = vmul.f32 %v2264_v22, %v2254_v51 }
 0x967   : > { %v2302_v63 = vld [vmem:[#allocation2 + $0x18] sm:$0xff]  ;;  %v2301_v36 = vld [vmem:[#allocation2 + $0x10] sm:$0xff] }
 0x968   : > { %v2271_v39 = vrot.slane %v2267_v52, 4  ;;  %v2272_v40 = vrot.slane %v2268_v31, 4  ;;  %v2230_v41 = vpop.permute.xlu0 %2229  ;;  %v2228_v19 = vpop.permute.xlu1 %2227  ;;  %v2597_v20 = vpack.c.bf16 %v2302_v63, %v2300_v37  ;;  %v2599_v42 = vpack.c.bf16 %v2301_v36, %v2299_v1 }
 0x969   : > { %v2231_v43 = vsel %vm568_vm7, %v2228_v19, %v2230_v41  ;;  %v2232_v44 = vsel %vm568_vm7, %v2230_v41, %v2228_v19 }
 0x96a   : > { %2275 = vst [vmem:[#allocation2 + $0x30] sm:$0xf0] %v2271_v39  ;;  %2276 = vst [vmem:[#allocation2 + $0x38] sm:$0xf0] %v2272_v40  ;;  %v2245_v45 = vmul.f32 %v2238_v34, %v2231_v43  ;;  %v2246_v46 = vmul.f32 %v2242_v38, %v2232_v44  ;;  %2598 = vmatprep.subr.bf16.mxu0 %v2597_v20 }
 0x96b   : > { %2600 = vmatpush1.bf16.msra.mxu0 %v2599_v42 }
 0x96c   : > { %2247 = vst [vmem:[#allocation2 + $0x30] sm:$0xf] %v2245_v45  ;;  %2248 = vst [vmem:[#allocation2 + $0x38] sm:$0xf] %v2246_v46  ;;  %v2280_v53 = vpop.permute.xlu0 %2279  ;;  %v2278_v54 = vpop.permute.xlu1 %2277 }
 0x96d   : > { %v2281_v55 = vsel %vm622_vm8, %v2278_v54, %v2280_v53  ;;  %v2282_v0 = vsel %vm622_vm8, %v2280_v53, %v2278_v54  ;;  %v2304_v49 = vld [vmem:[#allocation2 + $0x28] sm:$0xff]  ;;  %v2303_v13 = vld [vmem:[#allocation2 + $0x20] sm:$0xff] }
 0x96e   : > { %v2295_v56 = vmul.f32 %v2288_v47, %v2281_v55  ;;  %v2296_v57 = vmul.f32 %v2292_v50, %v2282_v0 }
 0x970   : > { %2297 = vst [vmem:[#allocation2 + $0x40] sm:$0xf] %v2295_v56  ;;  %2298 = vst [vmem:[#allocation2 + $0x48] sm:$0xf] %v2296_v57 }
 0x973   : > { %v2306_v58 = vld [vmem:[#allocation2 + $0x38] sm:$0xff]  ;;  %v2305_v48 = vld [vmem:[#allocation2 + $0x30] sm:$0xff] }
 0x974   : > { %v2601_v14 = vpack.c.bf16 %v2306_v58, %v2304_v49  ;;  %v2603_v61 = vpack.c.bf16 %v2305_v48, %v2303_v13 }
 0x976   : > { %2602 = vmatprep.subr.bf16.mxu0 %v2601_v14 }
 0x977   : > { %2604 = vmatpush1.bf16.msra.mxu0 %v2603_v61  ;;  %v2308_v62 = vld [vmem:[#allocation2 + $0x48] sm:$0xf]  ;;  %v2307_v2 = vld [vmem:[#allocation2 + $0x40] sm:$0xf] }
 0x978   : > { %2550 = vmatprep.subr.msk.mxu0 %vm661_vm9, %v2308_v62 }
 0x97b   : > { %2551 = vmatpush1.msk.msra.mxu0 %vm661_vm9, %v2307_v2 }
 0x97c   : > { %2552 = vmatmul.mubr.msk.f32.vlgmr.msra.gmra.mrb[6].mxu0 %vm657_vm10, %v2529_v12 }
 0x97d   : > { %v1672_v3 = vpop.permute.xlu1 %1671  ;;  %v2312_v39 = vpop.permute.xlu0 %2311 }
 0x97e   : > { %v1750_v59 = vadd.f32 %v3341_v26, %v1672_v3  ;;  %v1752_v60 = vadd.f32 %v3343_v27, %v1672_v3 }
 0x980   : > { %vm1754_vm1 = vcmp.gt.f32.partialorder %v1750_v59, 0.0  ;;  %v1756_v5 = vmul.f32 0.2, %v1750_v59  ;;  %vm1755_vm2 = vcmp.gt.f32.partialorder %v1752_v60, 0.0  ;;  %v1757_v9 = vmul.f32 0.2, %v1752_v60 }
 0x982   : > { %v1758_v10 = vsel %vm1754_vm1, %v1750_v59, %v1756_v5  ;;  %v1759_v11 = vsel %vm1755_vm2, %v1752_v60, %v1757_v9 }
 0x983   : > { %v1760_v15 = vadd.f32 %v1758_v10, %v2964_v28  ;;  %v1761_v32 = vadd.f32 %v1759_v11, %v2967_v29 }
 0x985   : > { %v1762_v33 = vsub.f32 0.0, %v1760_v15  ;;  %v1763_v16 = vsub.f32 0.0, %v1761_v32 }
 0x987   : > { %v1764_v17 = vmul.f32 1.442695, %v1762_v33  ;;  %v1766_v18 = vmul.f32 1.442695, %v1763_v16 }
 0x989   : > { %2631 = vpow2.f32 %v1764_v17 }
 0x98a   : > { %2633 = vpow2.f32 %v1766_v18 }
 0x993   : > { %v2632_v21 = vpop.eup %2631 }
 0x994   : > { %v2634_v26 = vpop.eup %2633  ;;  %v1768_v22 = vadd.f32 1.0, %v2632_v21 }
 0x995   : > { %v1769_v27 = vadd.f32 1.0, %v2634_v26 }
 0x996   : > { %2635 = vrcp.f32 %v1768_v22 }
 0x997   : > { %2637 = vrcp.f32 %v1769_v27 }
 0x9a0   : > { %v2636_v23 = vpop.eup %2635 }
 0x9a1   : > { %v2638_v24 = vpop.eup %2637  ;;  %v1774_v25 = vmul.f32 2.0, %v2636_v23 }
 0x9a2   : > { %v1775_v8 = vmul.f32 2.0, %v2638_v24 }
 0x9a3   : > { %v2525_v7 = vadd.f32 -1.0, %v1774_v25 }
 0x9a4   : > { %v2526_v30 = vadd.f32 -1.0, %v1775_v8 }
 0x9a5   : > { %v1778_v51 = vmul.f32 0.8, %v2525_v7 }
 0x9a6   : > { %v1779_v52 = vmul.f32 0.8, %v2526_v30 }
 0x9a7   : > { %v1780_v31 = vmul.f32 1.442695, %v1778_v51 }
 0x9a8   : > { %v1782_v34 = vmul.f32 1.442695, %v1779_v52 }
 0x9a9   : > { %2639 = vpow2.f32 %v1780_v31 }
 0x9aa   : > { %2641 = vpow2.f32 %v1782_v34 }
 0x9b3   : > { %v2640_v38 = vpop.eup %2639 }
 0x9b4   : > { %v2642_v37 = vpop.eup %2641  ;;  %v1786_v35 = vrot.slane %v2640_v38, 4 }
 0x9b5   : > { %v1787_v63 = vrot.slane %v2642_v37, 4 }
 0x9b6   : > { %v1790_v1 = vmul.f32 %v1786_v35, %v2733_v4 }
 0x9b7   : > { %v1791_v36 = vmul.f32 %v1787_v63, %v2736_v6 }
 0xa4f   : > { %v2389_v40 = vpop.f32.mrb[6].mxu0 }
 0xa50   : > { %v2390_v41 = vadd.f32 %v2389_v40, %v2312_v39  ;;  %v2391_v19 = vpop.f32.mrb[7].mxu0 }
 0xa51   : > { %v2392_v20 = vadd.f32 %v2391_v19, %v2312_v39 }
 0xa52   : > { %vm2394_vm3 = vcmp.gt.f32.partialorder %v2390_v41, 0.0  ;;  %v2396_v42 = vmul.f32 0.2, %v2390_v41 }
 0xa53   : > { %vm2395_vm4 = vcmp.gt.f32.partialorder %v2392_v20, 0.0  ;;  %v2397_v43 = vmul.f32 0.2, %v2392_v20 }
 0xa54   : > { %v2398_v44 = vsel %vm2394_vm3, %v2390_v41, %v2396_v42 }
 0xa55   : > { %v2400_v45 = vadd.f32 %v2398_v44, %v2964_v28  ;;  %v2399_v46 = vsel %vm2395_vm4, %v2392_v20, %v2397_v43 }
 0xa56   : > { %v2401_v47 = vadd.f32 %v2399_v46, %v2967_v29 }
 0xa57   : > { %v2404_v50 = vrot.slane %v2400_v45, 4 }
 0xa58   : > { %v2405_v4 = vrot.slane %v2401_v47, 4 }
 0xa59   : > { %v2408_v6 = vadd.f32 %v2404_v50, %v1790_v1 }
 0xa5a   : > { %v2409_v53 = vadd.f32 %v2405_v4, %v1791_v36 }
 0xa5b   : > { %v2410_v54 = vsel %vm661_vm9, %v2964_v28, %v2408_v6 }
 0xa5c   : > { %2412 = vst [vmem:[%s332_s23] sm:$0xff] %v2410_v54  ;;  %v2411_v55 = vsel %vm661_vm9, %v2967_v29, %v2409_v53 }
 0xa5d   : > { %2413 = vst [vmem:[%s332_s23 + $0x8] sm:$0xff] %v2411_v55 }
 0xa5e PF: > { %s19_s30 = sadd.s32 1, %s2649_s30  }
 0xa5f   : > { %p16_p4 = scmp.ge.s32.totalorder %s19_s30, 4  }
 0xa61   :  { %18 = sbr.rel (!%p16_p4) target bundleno = 1 (0x1), region = 105 }

</bundles_post_ra>
